<compile_context>
chip_gen: v5e
topology: v5e:2x2
jax: 0.10.0
libtpu: 0.0.40
codegen_flags: <defaults>
</compile_context>

<pallas_src>
import math

import jax
import jax.numpy as jnp
import numpy as np
from jax.experimental import pallas as pl
from jax.experimental.pallas import tpu as pltpu


def _round_up(x, m):
    return (x + m - 1) // m * m


def _largest_divisor(n, cap, step):
    """Largest divisor of n that is <= cap and a multiple of step (n is a multiple of step)."""
    cand = min(n, (cap // step) * step)
    while cand >= step:
        if n % cand == 0:
            return cand
        cand -= step
    return step


# ----------------------------------------------------------------------------- kernels


def lstm_recurrence_kernel(xg_ref, whh_ref, h_out_ref, h_ref, c_ref):
    """One grid step == one chunk of Tc time steps.

    xg_ref    : (Tc*Bp, 4*Hp) bf16 — precomputed x @ W_ih^T + b for this chunk (time-major rows)
    whh_ref   : (Hp, 4*Hp)    bf16 — resident recurrent weight (constant block, single-buffered)
    h_out_ref : (Tc*Bp, Hp)   bf16 — lane-dense 2-D output slab
    h_ref/c_ref : (Bp, Hp)    f32  — recurrent carries
    """
    Bp, Hp = h_ref.shape
    Tc = h_out_ref.shape[0] // Bp

    @pl.when(pl.program_id(0) == 0)
    def _():
        h_ref[...] = jnp.zeros_like(h_ref)
        c_ref[...] = jnp.zeros_like(c_ref)

    whh = whh_ref[...]  # hoisted once per chunk, reused by every step

    def step(s, carry):
        row = pl.multiple_of(s * Bp, Bp)
        xg = xg_ref[pl.ds(row, Bp), :].astype(jnp.float32)          # (Bp, 4*Hp)
        h_bf = h_ref[...].astype(jnp.bfloat16)
        gates = xg + jnp.dot(h_bf, whh, preferred_element_type=jnp.float32)
        # PyTorch gate order: i, f, g, o (each padded to Hp lanes; padded lanes stay exactly 0).
        i = jax.nn.sigmoid(gates[:, 0 * Hp:1 * Hp])
        f = jax.nn.sigmoid(gates[:, 1 * Hp:2 * Hp])
        g = jnp.tanh(gates[:, 2 * Hp:3 * Hp])
        o = jax.nn.sigmoid(gates[:, 3 * Hp:4 * Hp])
        c_new = f * c_ref[...] + i * g
        h_new = o * jnp.tanh(c_new)
        c_ref[...] = c_new
        h_ref[...] = h_new
        h_out_ref[pl.ds(row, Bp), :] = h_new.astype(h_out_ref.dtype)
        return carry

    unroll = True if Tc <= 16 else 8
    jax.lax.fori_loop(0, Tc, step, 0, unroll=unroll)


def projection_kernel(h_ref, w_ref, out_ref):
    """Parallel output projection: (Tm, Hp)bf16 @ (Hp, Tn)bf16 -> (Tm, Tn)f32."""
    out_ref[...] = jnp.dot(h_ref[...], w_ref[...], preferred_element_type=jnp.float32)


# ----------------------------------------------------------------------------- wrapper


def prepare_params(emb_w, w_ih, w_hh, b_ih, b_hh, w_out, lane=128):
    """Repack PyTorch-layout weights into lane-padded, gate-blocked kernel layouts."""
    V, E = emb_w.shape
    H = w_hh.shape[1]
    Hp = _round_up(H, lane)
    Vp = _round_up(V, lane)
    G = 4 * Hp
    b = b_ih + b_hh

    wih_t_p = jnp.zeros((E, G), jnp.float32)
    whh_t_p = jnp.zeros((Hp, G), jnp.float32)
    bias_p = jnp.zeros((G,), jnp.float32)
    for k in range(4):  # gate order i, f, g, o; each gate gets its own Hp-wide lane block
        wih_t_p = wih_t_p.at[:, k * Hp:k * Hp + H].set(w_ih[k * H:(k + 1) * H, :].T)
        whh_t_p = whh_t_p.at[:H, k * Hp:k * Hp + H].set(w_hh[k * H:(k + 1) * H, :].T)
        bias_p = bias_p.at[k * Hp:k * Hp + H].set(b[k * H:(k + 1) * H])

    # bf16 weights for the MXU (f32 accumulation in-kernel); zero padding keeps padded lanes inert.
    whh_t_p = whh_t_p.astype(jnp.bfloat16)
    wout_t_p = jnp.zeros((Hp, Vp), jnp.float32).at[:H, :V].set(w_out.T).astype(jnp.bfloat16)

    return {
        "emb": emb_w,
        "wih_t": wih_t_p,      # (E, 4*Hp)  f32  (used in the parallel XLA input projection)
        "whh_t": whh_t_p,      # (Hp, 4*Hp) bf16 (resident in the recurrence kernel)
        "bias": bias_p,        # (4*Hp,)    f32
        "wout_t": wout_t_p,    # (Hp, Vp)   bf16
        "dims": (E, H, Hp, V, Vp),
    }


def lm_lstm_forward(input_sequence, params, *, time_chunk=32):
    E, H, Hp, V, Vp = params["dims"]
    B, T = input_sequence.shape
    Bp = _round_up(max(B, 8), 8)          # sublane-align the batch
    Tc = min(time_chunk, T)               # time steps per grid iteration
    T_pad = _round_up(T, Tc)
    G = 4 * Hp
    M = T_pad * Bp

    # --- Stage 1 (XLA): time-major embedding gather (no (B,T,E) transpose pass) and the batched
    # input projection for all time steps at once.  xg is stored bf16 (largest serial-stage stream).
    emb_tm = jnp.take(params["emb"], input_sequence.T, axis=0)          # (T, B, E)
    emb_tm = jnp.pad(emb_tm, ((0, T_pad - T), (0, Bp - B), (0, 0)))     # (T_pad, Bp, E)
    xg = emb_tm.reshape(M, E) @ params["wih_t"] + params["bias"]
    xg = xg.astype(jnp.bfloat16)                                        # (M, 4*Hp)

    # --- Stage 2 (Pallas, sequential): the LSTM recurrence only.
    n_chunks = T_pad // Tc
    rec_vmem = (Hp * G * 2                    # resident W_hh^T, bf16, single-buffered
                + 2 * Tc * Bp * G * 2         # xg chunk, bf16, double-buffered
                + 2 * Tc * Bp * Hp * 2        # h_out chunk, bf16, double-buffered
                + 2 * Bp * Hp * 4             # f32 h/c carries
                + (4 << 20))                  # margin
    rec_limit = int(min(max(rec_vmem, 32 << 20), 64 << 20))
    h_all = pl.pallas_call(
        lstm_recurrence_kernel,
        out_shape=jax.ShapeDtypeStruct((M, Hp), jnp.bfloat16),
        grid_spec=pltpu.PrefetchScalarGridSpec(
            num_scalar_prefetch=0,
            grid=(n_chunks,),
            in_specs=[
                pl.BlockSpec((Tc * Bp, G), lambda c: (c, 0)),            # gate inputs (bf16)
                pl.BlockSpec((Hp, G), lambda c: (0, 0),
                             pipeline_mode=pl.Buffered(1)),              # resident W_hh^T (bf16)
            ],
            out_specs=pl.BlockSpec((Tc * Bp, Hp), lambda c: (c, 0)),     # lane-dense 2-D h slab
            scratch_shapes=[
                pltpu.VMEM((Bp, Hp), jnp.float32),   # h carry (f32)
                pltpu.VMEM((Bp, Hp), jnp.float32),   # c carry (f32)
            ],
        ),
        compiler_params=pltpu.CompilerParams(
            dimension_semantics=("arbitrary",),      # recurrence must run in order
            vmem_limit_bytes=rec_limit),
    )(xg, params["whh_t"])

    # --- Stage 3 (Pallas, parallel): output projection over all T*B rows at full MXU rate.
    # Grid is (n, m) with the small M axis innermost: W_out's block index is constant along m,
    # so the (Hp,Vp) vocab weight is streamed once per n block instead of once per m block.
    Tm = _largest_divisor(M, 512, 8)
    Tn = _largest_divisor(Vp, 1024, 128)
    proj_vmem = 2 * (Tm * Hp * 2 + Hp * Tn * 2 + Tm * Tn * 4) + (2 << 20)
    proj_limit = int(min(max(proj_vmem, 32 << 20), 64 << 20))
    logits = pl.pallas_call(
        projection_kernel,
        out_shape=jax.ShapeDtypeStruct((M, Vp), jnp.float32),
        grid_spec=pltpu.PrefetchScalarGridSpec(
            num_scalar_prefetch=0,
            grid=(Vp // Tn, M // Tm),
            in_specs=[
                pl.BlockSpec((Tm, Hp), lambda n, m: (m, 0)),
                pl.BlockSpec((Hp, Tn), lambda n, m: (0, n)),
            ],
            out_specs=pl.BlockSpec((Tm, Tn), lambda n, m: (m, n)),
        ),
        compiler_params=pltpu.CompilerParams(
            dimension_semantics=("parallel", "parallel"),
            vmem_limit_bytes=proj_limit),
    )(h_all, params["wout_t"])

    # Strip padding; (T, B, V) -> (B, V, T) == PyTorch output.permute(0, 2, 1).
    logits = logits.reshape(T_pad, Bp, Vp)[:T, :B, :V]
    return jnp.transpose(logits, (1, 2, 0))


# ----------------------------------------------------------------------------- reference


def reference_forward(tokens, emb_w, w_ih, w_hh, b_ih, b_hh, w_out):
    """Pure-JAX f32 reference of the PyTorch forward (eval mode)."""
    emb = jnp.take(emb_w, tokens, axis=0)           # (B, T, E)
    B, T, _ = emb.shape
    H = w_hh.shape[1]

    def step(carry, x_t):
        h, c = carry
        gates = x_t @ w_ih.T + b_ih + h @ w_hh.T + b_hh
        i, f, g, o = jnp.split(gates, 4, axis=-1)
        i, f, o = jax.nn.sigmoid(i), jax.nn.sigmoid(f), jax.nn.sigmoid(o)
        g = jnp.tanh(g)
        c = f * c + i * g
        h = o * jnp.tanh(c)
        return (h, c), h

    h0 = jnp.zeros((B, H), jnp.float32)
    (_, _), hs = jax.lax.scan(step, (h0, h0), jnp.transpose(emb, (1, 0, 2)))
    rnn_out = jnp.transpose(hs, (1, 0, 2))          # (B, T, H)
    logits = rnn_out @ w_out.T                      # (B, T, V)
    return jnp.transpose(logits, (0, 2, 1))         # (B, V, T)


if __name__ == "__main__":
    B, T = 2, 8
    E, H, V = 32, 32, 16            # emb_size, hidden_size, output_size (vocab)
    pad_index = 0

    key = jax.random.PRNGKey(0)
    k_emb, k_wih, k_whh, k_bih, k_bhh, k_out, k_inp = jax.random.split(key, 7)

    scale = 1.0 / float(np.sqrt(H))
    emb_w = jax.random.normal(k_emb, (V, E), jnp.float32)
    emb_w = emb_w.at[pad_index].set(0.0)   # nn.Embedding(padding_idx=0) zeroes that row
    w_ih = jax.random.uniform(k_wih, (4 * H, E), jnp.float32, -scale, scale)
    w_hh = jax.random.uniform(k_whh, (4 * H, H), jnp.float32, -scale, scale)
    b_ih = jax.random.uniform(k_bih, (4 * H,), jnp.float32, -scale, scale)
    b_hh = jax.random.uniform(k_bhh, (4 * H,), jnp.float32, -scale, scale)
    w_out = jax.random.uniform(k_out, (V, H), jnp.float32, -scale, scale)

    params = prepare_params(emb_w, w_ih, w_hh, b_ih, b_hh, w_out)
    tokens = jax.random.randint(k_inp, (B, T), 0, V, dtype=jnp.int32)

    out = jax.block_until_ready(lm_lstm_forward(tokens, params))
    assert out.shape == (B, V, T), out.shape

    ref = reference_forward(tokens, emb_w, w_ih, w_hh, b_ih, b_hh, w_out)
    # bf16 recurrent matmul + bf16 output projection (f32 accumulation) -> loosened tolerance.
    np.testing.assert_allclose(np.asarray(out), np.asarray(ref), rtol=2e-2, atol=2e-2)
    print("KERNEL_OK")
</pallas_src>

<mosaic_0001>
module attributes {stable_mosaic.version = 11 : i64} {
  func.func @lstm_recurrence_kernel(%arg0: i32, %arg1: memref<64x512xbf16, #tpu.memory_space<vmem>>, %arg2: memref<128x512xbf16, #tpu.memory_space<vmem>>, %arg3: memref<64x128xbf16, #tpu.memory_space<vmem>>, %arg4: memref<8x128xf32, #tpu.memory_space<vmem>>, %arg5: memref<8x128xf32, #tpu.memory_space<vmem>>) attributes {dimension_semantics = [#tpu.dimension_semantics<arbitrary>], iteration_bounds = array<i64: 1>, scalar_prefetch = 0 : i64, scratch_operands = 2 : i64, tpu.core_type = #tpu.core_type<tc>, window_params = [{transform_indices = @transform_0, window_bounds = array<i64: 64, 512>}, {pipeline_mode = #tpu.pipeline_mode<synchronous>, transform_indices = @transform_1, window_bounds = array<i64: 128, 512>}, {transform_indices = @transform_2, window_bounds = array<i64: 64, 128>}]} {
    %c0_i32 = arith.constant 0 : i32
    %0 = arith.cmpi eq, %arg0, %c0_i32 : i32
    %1 = arith.extui %0 : i1 to i32
    %c0_i32_0 = arith.constant 0 : i32
    %2 = arith.cmpi ne, %1, %c0_i32_0 : i32
    scf.if %2 {
      %cst_122 = arith.constant 0.000000e+00 : f32
      %324 = vector.broadcast %cst_122 : f32 to vector<8x128xf32>
      %c0_123 = arith.constant 0 : index
      %c0_124 = arith.constant 0 : index
      %325 = vector.load %arg4[%c0_123, %c0_124] : memref<8x128xf32, #tpu.memory_space<vmem>>, vector<8x128xf32>
      tpu.vector_store %arg4[%c0_123, %c0_124], %324 {strides = array<i32>} : memref<8x128xf32, #tpu.memory_space<vmem>>, vector<8x128xf32>,
      %cst_125 = arith.constant 0.000000e+00 : f32
      %326 = vector.broadcast %cst_125 : f32 to vector<8x128xf32>
      %c0_126 = arith.constant 0 : index
      %c0_127 = arith.constant 0 : index
      %327 = vector.load %arg5[%c0_126, %c0_127] : memref<8x128xf32, #tpu.memory_space<vmem>>, vector<8x128xf32>
      tpu.vector_store %arg5[%c0_126, %c0_127], %326 {strides = array<i32>} : memref<8x128xf32, #tpu.memory_space<vmem>>, vector<8x128xf32>,
    } else {
    }
    %c0 = arith.constant 0 : index
    %c0_1 = arith.constant 0 : index
    %3 = vector.load %arg2[%c0, %c0_1] : memref<128x512xbf16, #tpu.memory_space<vmem>>, vector<128x512xbf16>
    %c0_i32_2 = arith.constant 0 : i32
    %c8_i32 = arith.constant 8 : i32
    %4 = arith.muli %c0_i32_2, %c8_i32 : i32
    %5 = tpu.assume_multiple %4, 8 : i32
    %6 = arith.index_cast %5 : i32 to index
    %c0_3 = arith.constant 0 : index
    %7 = vector.load %arg1[%6, %c0_3] : memref<64x512xbf16, #tpu.memory_space<vmem>>, vector<8x512xbf16>
    %8 = arith.extf %7 : vector<8x512xbf16> to vector<8x512xf32>
    %c0_4 = arith.constant 0 : index
    %c0_5 = arith.constant 0 : index
    %9 = vector.load %arg4[%c0_4, %c0_5] : memref<8x128xf32, #tpu.memory_space<vmem>>, vector<8x128xf32>
    %10 = arith.truncf %9 : vector<8x128xf32> to vector<8x128xbf16>
    %cst = arith.constant dense<0.000000e+00> : vector<8x512xf32>
    %11 = tpu.matmul %10, %3, %cst {dimension_numbers = #tpu.dot_dimension_numbers<[1], [0], [0], [1], [0, 0, 1, 1], [], []>} : vector<8x128xbf16>, vector<128x512xbf16>, vector<8x512xf32> -> vector<8x512xf32>
    %12 = arith.addf %8, %11 : vector<8x512xf32>
    %13 = vector.extract_strided_slice %12 {offsets = [0, 0], sizes = [8, 128], strides = [1, 1]} : vector<8x512xf32> to vector<8x128xf32>
    %14 = arith.negf %13 : vector<8x128xf32>
    %15 = math.exp %14 : vector<8x128xf32>
    %cst_6 = arith.constant 1.000000e+00 : f32
    %16 = vector.broadcast %cst_6 : f32 to vector<8x128xf32>
    %17 = arith.addf %16, %15 : vector<8x128xf32>
    %18 = arith.divf %16, %17 : vector<8x128xf32>
    %19 = vector.extract_strided_slice %12 {offsets = [0, 128], sizes = [8, 128], strides = [1, 1]} : vector<8x512xf32> to vector<8x128xf32>
    %20 = arith.negf %19 : vector<8x128xf32>
    %21 = math.exp %20 : vector<8x128xf32>
    %cst_7 = arith.constant 1.000000e+00 : f32
    %22 = vector.broadcast %cst_7 : f32 to vector<8x128xf32>
    %23 = arith.addf %22, %21 : vector<8x128xf32>
    %24 = arith.divf %22, %23 : vector<8x128xf32>
    %25 = vector.extract_strided_slice %12 {offsets = [0, 256], sizes = [8, 128], strides = [1, 1]} : vector<8x512xf32> to vector<8x128xf32>
    %26 = math.tanh %25 : vector<8x128xf32>
    %27 = vector.extract_strided_slice %12 {offsets = [0, 384], sizes = [8, 128], strides = [1, 1]} : vector<8x512xf32> to vector<8x128xf32>
    %28 = arith.negf %27 : vector<8x128xf32>
    %29 = math.exp %28 : vector<8x128xf32>
    %cst_8 = arith.constant 1.000000e+00 : f32
    %30 = vector.broadcast %cst_8 : f32 to vector<8x128xf32>
    %31 = arith.addf %30, %29 : vector<8x128xf32>
    %32 = arith.divf %30, %31 : vector<8x128xf32>
    %c0_9 = arith.constant 0 : index
    %c0_10 = arith.constant 0 : index
    %33 = vector.load %arg5[%c0_9, %c0_10] : memref<8x128xf32, #tpu.memory_space<vmem>>, vector<8x128xf32>
    %34 = arith.mulf %24, %33 : vector<8x128xf32>
    %35 = arith.mulf %18, %26 : vector<8x128xf32>
    %36 = arith.addf %34, %35 : vector<8x128xf32>
    %37 = math.tanh %36 : vector<8x128xf32>
    %38 = arith.mulf %32, %37 : vector<8x128xf32>
    %c0_11 = arith.constant 0 : index
    %c0_12 = arith.constant 0 : index
    %39 = vector.load %arg5[%c0_11, %c0_12] : memref<8x128xf32, #tpu.memory_space<vmem>>, vector<8x128xf32>
    tpu.vector_store %arg5[%c0_11, %c0_12], %36 {strides = array<i32>} : memref<8x128xf32, #tpu.memory_space<vmem>>, vector<8x128xf32>,
    %c0_13 = arith.constant 0 : index
    %c0_14 = arith.constant 0 : index
    %40 = vector.load %arg4[%c0_13, %c0_14] : memref<8x128xf32, #tpu.memory_space<vmem>>, vector<8x128xf32>
    tpu.vector_store %arg4[%c0_13, %c0_14], %38 {strides = array<i32>} : memref<8x128xf32, #tpu.memory_space<vmem>>, vector<8x128xf32>,
    %41 = arith.truncf %38 : vector<8x128xf32> to vector<8x128xbf16>
    %42 = arith.index_cast %5 : i32 to index
    %c0_15 = arith.constant 0 : index
    %43 = vector.load %arg3[%42, %c0_15] : memref<64x128xbf16, #tpu.memory_space<vmem>>, vector<8x128xbf16>
    tpu.vector_store %arg3[%42, %c0_15], %41 {strides = array<i32>} : memref<64x128xbf16, #tpu.memory_space<vmem>>, vector<8x128xbf16>,
    %c1_i32 = arith.constant 1 : i32
    %c8_i32_16 = arith.constant 8 : i32
    %44 = arith.muli %c1_i32, %c8_i32_16 : i32
    %45 = tpu.assume_multiple %44, 8 : i32
    %46 = arith.index_cast %45 : i32 to index
    %c0_17 = arith.constant 0 : index
    %47 = vector.load %arg1[%46, %c0_17] : memref<64x512xbf16, #tpu.memory_space<vmem>>, vector<8x512xbf16>
    %48 = arith.extf %47 : vector<8x512xbf16> to vector<8x512xf32>
    %c0_18 = arith.constant 0 : index
    %c0_19 = arith.constant 0 : index
    %49 = vector.load %arg4[%c0_18, %c0_19] : memref<8x128xf32, #tpu.memory_space<vmem>>, vector<8x128xf32>
    %50 = arith.truncf %49 : vector<8x128xf32> to vector<8x128xbf16>
    %cst_20 = arith.constant dense<0.000000e+00> : vector<8x512xf32>
    %51 = tpu.matmul %50, %3, %cst_20 {dimension_numbers = #tpu.dot_dimension_numbers<[1], [0], [0], [1], [0, 0, 1, 1], [], []>} : vector<8x128xbf16>, vector<128x512xbf16>, vector<8x512xf32> -> vector<8x512xf32>
    %52 = arith.addf %48, %51 : vector<8x512xf32>
    %53 = vector.extract_strided_slice %52 {offsets = [0, 0], sizes = [8, 128], strides = [1, 1]} : vector<8x512xf32> to vector<8x128xf32>
    %54 = arith.negf %53 : vector<8x128xf32>
    %55 = math.exp %54 : vector<8x128xf32>
    %cst_21 = arith.constant 1.000000e+00 : f32
    %56 = vector.broadcast %cst_21 : f32 to vector<8x128xf32>
    %57 = arith.addf %56, %55 : vector<8x128xf32>
    %58 = arith.divf %56, %57 : vector<8x128xf32>
    %59 = vector.extract_strided_slice %52 {offsets = [0, 128], sizes = [8, 128], strides = [1, 1]} : vector<8x512xf32> to vector<8x128xf32>
    %60 = arith.negf %59 : vector<8x128xf32>
    %61 = math.exp %60 : vector<8x128xf32>
    %cst_22 = arith.constant 1.000000e+00 : f32
    %62 = vector.broadcast %cst_22 : f32 to vector<8x128xf32>
    %63 = arith.addf %62, %61 : vector<8x128xf32>
    %64 = arith.divf %62, %63 : vector<8x128xf32>
    %65 = vector.extract_strided_slice %52 {offsets = [0, 256], sizes = [8, 128], strides = [1, 1]} : vector<8x512xf32> to vector<8x128xf32>
    %66 = math.tanh %65 : vector<8x128xf32>
    %67 = vector.extract_strided_slice %52 {offsets = [0, 384], sizes = [8, 128], strides = [1, 1]} : vector<8x512xf32> to vector<8x128xf32>
    %68 = arith.negf %67 : vector<8x128xf32>
    %69 = math.exp %68 : vector<8x128xf32>
    %cst_23 = arith.constant 1.000000e+00 : f32
    %70 = vector.broadcast %cst_23 : f32 to vector<8x128xf32>
    %71 = arith.addf %70, %69 : vector<8x128xf32>
    %72 = arith.divf %70, %71 : vector<8x128xf32>
    %c0_24 = arith.constant 0 : index
    %c0_25 = arith.constant 0 : index
    %73 = vector.load %arg5[%c0_24, %c0_25] : memref<8x128xf32, #tpu.memory_space<vmem>>, vector<8x128xf32>
    %74 = arith.mulf %64, %73 : vector<8x128xf32>
    %75 = arith.mulf %58, %66 : vector<8x128xf32>
    %76 = arith.addf %74, %75 : vector<8x128xf32>
    %77 = math.tanh %76 : vector<8x128xf32>
    %78 = arith.mulf %72, %77 : vector<8x128xf32>
    %c0_26 = arith.constant 0 : index
    %c0_27 = arith.constant 0 : index
    %79 = vector.load %arg5[%c0_26, %c0_27] : memref<8x128xf32, #tpu.memory_space<vmem>>, vector<8x128xf32>
    tpu.vector_store %arg5[%c0_26, %c0_27], %76 {strides = array<i32>} : memref<8x128xf32, #tpu.memory_space<vmem>>, vector<8x128xf32>,
    %c0_28 = arith.constant 0 : index
    %c0_29 = arith.constant 0 : index
    %80 = vector.load %arg4[%c0_28, %c0_29] : memref<8x128xf32, #tpu.memory_space<vmem>>, vector<8x128xf32>
    tpu.vector_store %arg4[%c0_28, %c0_29], %78 {strides = array<i32>} : memref<8x128xf32, #tpu.memory_space<vmem>>, vector<8x128xf32>,
    %81 = arith.truncf %78 : vector<8x128xf32> to vector<8x128xbf16>
    %82 = arith.index_cast %45 : i32 to index
    %c0_30 = arith.constant 0 : index
    %83 = vector.load %arg3[%82, %c0_30] : memref<64x128xbf16, #tpu.memory_space<vmem>>, vector<8x128xbf16>
    tpu.vector_store %arg3[%82, %c0_30], %81 {strides = array<i32>} : memref<64x128xbf16, #tpu.memory_space<vmem>>, vector<8x128xbf16>,
    %c2_i32 = arith.constant 2 : i32
    %c8_i32_31 = arith.constant 8 : i32
    %84 = arith.muli %c2_i32, %c8_i32_31 : i32
    %85 = tpu.assume_multiple %84, 8 : i32
    %86 = arith.index_cast %85 : i32 to index
    %c0_32 = arith.constant 0 : index
    %87 = vector.load %arg1[%86, %c0_32] : memref<64x512xbf16, #tpu.memory_space<vmem>>, vector<8x512xbf16>
    %88 = arith.extf %87 : vector<8x512xbf16> to vector<8x512xf32>
    %c0_33 = arith.constant 0 : index
    %c0_34 = arith.constant 0 : index
    %89 = vector.load %arg4[%c0_33, %c0_34] : memref<8x128xf32, #tpu.memory_space<vmem>>, vector<8x128xf32>
    %90 = arith.truncf %89 : vector<8x128xf32> to vector<8x128xbf16>
    %cst_35 = arith.constant dense<0.000000e+00> : vector<8x512xf32>
    %91 = tpu.matmul %90, %3, %cst_35 {dimension_numbers = #tpu.dot_dimension_numbers<[1], [0], [0], [1], [0, 0, 1, 1], [], []>} : vector<8x128xbf16>, vector<128x512xbf16>, vector<8x512xf32> -> vector<8x512xf32>
    %92 = arith.addf %88, %91 : vector<8x512xf32>
    %93 = vector.extract_strided_slice %92 {offsets = [0, 0], sizes = [8, 128], strides = [1, 1]} : vector<8x512xf32> to vector<8x128xf32>
    %94 = arith.negf %93 : vector<8x128xf32>
    %95 = math.exp %94 : vector<8x128xf32>
    %cst_36 = arith.constant 1.000000e+00 : f32
    %96 = vector.broadcast %cst_36 : f32 to vector<8x128xf32>
    %97 = arith.addf %96, %95 : vector<8x128xf32>
    %98 = arith.divf %96, %97 : vector<8x128xf32>
    %99 = vector.extract_strided_slice %92 {offsets = [0, 128], sizes = [8, 128], strides = [1, 1]} : vector<8x512xf32> to vector<8x128xf32>
    %100 = arith.negf %99 : vector<8x128xf32>
    %101 = math.exp %100 : vector<8x128xf32>
    %cst_37 = arith.constant 1.000000e+00 : f32
    %102 = vector.broadcast %cst_37 : f32 to vector<8x128xf32>
    %103 = arith.addf %102, %101 : vector<8x128xf32>
    %104 = arith.divf %102, %103 : vector<8x128xf32>
    %105 = vector.extract_strided_slice %92 {offsets = [0, 256], sizes = [8, 128], strides = [1, 1]} : vector<8x512xf32> to vector<8x128xf32>
    %106 = math.tanh %105 : vector<8x128xf32>
    %107 = vector.extract_strided_slice %92 {offsets = [0, 384], sizes = [8, 128], strides = [1, 1]} : vector<8x512xf32> to vector<8x128xf32>
    %108 = arith.negf %107 : vector<8x128xf32>
    %109 = math.exp %108 : vector<8x128xf32>
    %cst_38 = arith.constant 1.000000e+00 : f32
    %110 = vector.broadcast %cst_38 : f32 to vector<8x128xf32>
    %111 = arith.addf %110, %109 : vector<8x128xf32>
    %112 = arith.divf %110, %111 : vector<8x128xf32>
    %c0_39 = arith.constant 0 : index
    %c0_40 = arith.constant 0 : index
    %113 = vector.load %arg5[%c0_39, %c0_40] : memref<8x128xf32, #tpu.memory_space<vmem>>, vector<8x128xf32>
    %114 = arith.mulf %104, %113 : vector<8x128xf32>
    %115 = arith.mulf %98, %106 : vector<8x128xf32>
    %116 = arith.addf %114, %115 : vector<8x128xf32>
    %117 = math.tanh %116 : vector<8x128xf32>
    %118 = arith.mulf %112, %117 : vector<8x128xf32>
    %c0_41 = arith.constant 0 : index
    %c0_42 = arith.constant 0 : index
    %119 = vector.load %arg5[%c0_41, %c0_42] : memref<8x128xf32, #tpu.memory_space<vmem>>, vector<8x128xf32>
    tpu.vector_store %arg5[%c0_41, %c0_42], %116 {strides = array<i32>} : memref<8x128xf32, #tpu.memory_space<vmem>>, vector<8x128xf32>,
    %c0_43 = arith.constant 0 : index
    %c0_44 = arith.constant 0 : index
    %120 = vector.load %arg4[%c0_43, %c0_44] : memref<8x128xf32, #tpu.memory_space<vmem>>, vector<8x128xf32>
    tpu.vector_store %arg4[%c0_43, %c0_44], %118 {strides = array<i32>} : memref<8x128xf32, #tpu.memory_space<vmem>>, vector<8x128xf32>,
    %121 = arith.truncf %118 : vector<8x128xf32> to vector<8x128xbf16>
    %122 = arith.index_cast %85 : i32 to index
    %c0_45 = arith.constant 0 : index
    %123 = vector.load %arg3[%122, %c0_45] : memref<64x128xbf16, #tpu.memory_space<vmem>>, vector<8x128xbf16>
    tpu.vector_store %arg3[%122, %c0_45], %121 {strides = array<i32>} : memref<64x128xbf16, #tpu.memory_space<vmem>>, vector<8x128xbf16>,
    %c3_i32 = arith.constant 3 : i32
    %c8_i32_46 = arith.constant 8 : i32
    %124 = arith.muli %c3_i32, %c8_i32_46 : i32
    %125 = tpu.assume_multiple %124, 8 : i32
    %126 = arith.index_cast %125 : i32 to index
    %c0_47 = arith.constant 0 : index
    %127 = vector.load %arg1[%126, %c0_47] : memref<64x512xbf16, #tpu.memory_space<vmem>>, vector<8x512xbf16>
    %128 = arith.extf %127 : vector<8x512xbf16> to vector<8x512xf32>
    %c0_48 = arith.constant 0 : index
    %c0_49 = arith.constant 0 : index
    %129 = vector.load %arg4[%c0_48, %c0_49] : memref<8x128xf32, #tpu.memory_space<vmem>>, vector<8x128xf32>
    %130 = arith.truncf %129 : vector<8x128xf32> to vector<8x128xbf16>
    %cst_50 = arith.constant dense<0.000000e+00> : vector<8x512xf32>
    %131 = tpu.matmul %130, %3, %cst_50 {dimension_numbers = #tpu.dot_dimension_numbers<[1], [0], [0], [1], [0, 0, 1, 1], [], []>} : vector<8x128xbf16>, vector<128x512xbf16>, vector<8x512xf32> -> vector<8x512xf32>
    %132 = arith.addf %128, %131 : vector<8x512xf32>
    %133 = vector.extract_strided_slice %132 {offsets = [0, 0], sizes = [8, 128], strides = [1, 1]} : vector<8x512xf32> to vector<8x128xf32>
    %134 = arith.negf %133 : vector<8x128xf32>
    %135 = math.exp %134 : vector<8x128xf32>
    %cst_51 = arith.constant 1.000000e+00 : f32
    %136 = vector.broadcast %cst_51 : f32 to vector<8x128xf32>
    %137 = arith.addf %136, %135 : vector<8x128xf32>
    %138 = arith.divf %136, %137 : vector<8x128xf32>
    %139 = vector.extract_strided_slice %132 {offsets = [0, 128], sizes = [8, 128], strides = [1, 1]} : vector<8x512xf32> to vector<8x128xf32>
    %140 = arith.negf %139 : vector<8x128xf32>
    %141 = math.exp %140 : vector<8x128xf32>
    %cst_52 = arith.constant 1.000000e+00 : f32
    %142 = vector.broadcast %cst_52 : f32 to vector<8x128xf32>
    %143 = arith.addf %142, %141 : vector<8x128xf32>
    %144 = arith.divf %142, %143 : vector<8x128xf32>
    %145 = vector.extract_strided_slice %132 {offsets = [0, 256], sizes = [8, 128], strides = [1, 1]} : vector<8x512xf32> to vector<8x128xf32>
    %146 = math.tanh %145 : vector<8x128xf32>
    %147 = vector.extract_strided_slice %132 {offsets = [0, 384], sizes = [8, 128], strides = [1, 1]} : vector<8x512xf32> to vector<8x128xf32>
    %148 = arith.negf %147 : vector<8x128xf32>
    %149 = math.exp %148 : vector<8x128xf32>
    %cst_53 = arith.constant 1.000000e+00 : f32
    %150 = vector.broadcast %cst_53 : f32 to vector<8x128xf32>
    %151 = arith.addf %150, %149 : vector<8x128xf32>
    %152 = arith.divf %150, %151 : vector<8x128xf32>
    %c0_54 = arith.constant 0 : index
    %c0_55 = arith.constant 0 : index
    %153 = vector.load %arg5[%c0_54, %c0_55] : memref<8x128xf32, #tpu.memory_space<vmem>>, vector<8x128xf32>
    %154 = arith.mulf %144, %153 : vector<8x128xf32>
    %155 = arith.mulf %138, %146 : vector<8x128xf32>
    %156 = arith.addf %154, %155 : vector<8x128xf32>
    %157 = math.tanh %156 : vector<8x128xf32>
    %158 = arith.mulf %152, %157 : vector<8x128xf32>
    %c0_56 = arith.constant 0 : index
    %c0_57 = arith.constant 0 : index
    %159 = vector.load %arg5[%c0_56, %c0_57] : memref<8x128xf32, #tpu.memory_space<vmem>>, vector<8x128xf32>
    tpu.vector_store %arg5[%c0_56, %c0_57], %156 {strides = array<i32>} : memref<8x128xf32, #tpu.memory_space<vmem>>, vector<8x128xf32>,
    %c0_58 = arith.constant 0 : index
    %c0_59 = arith.constant 0 : index
    %160 = vector.load %arg4[%c0_58, %c0_59] : memref<8x128xf32, #tpu.memory_space<vmem>>, vector<8x128xf32>
    tpu.vector_store %arg4[%c0_58, %c0_59], %158 {strides = array<i32>} : memref<8x128xf32, #tpu.memory_space<vmem>>, vector<8x128xf32>,
    %161 = arith.truncf %158 : vector<8x128xf32> to vector<8x128xbf16>
    %162 = arith.index_cast %125 : i32 to index
    %c0_60 = arith.constant 0 : index
    %163 = vector.load %arg3[%162, %c0_60] : memref<64x128xbf16, #tpu.memory_space<vmem>>, vector<8x128xbf16>
    tpu.vector_store %arg3[%162, %c0_60], %161 {strides = array<i32>} : memref<64x128xbf16, #tpu.memory_space<vmem>>, vector<8x128xbf16>,
    %c4_i32 = arith.constant 4 : i32
    %c8_i32_61 = arith.constant 8 : i32
    %164 = arith.muli %c4_i32, %c8_i32_61 : i32
    %165 = tpu.assume_multiple %164, 8 : i32
    %166 = arith.index_cast %165 : i32 to index
    %c0_62 = arith.constant 0 : index
    %167 = vector.load %arg1[%166, %c0_62] : memref<64x512xbf16, #tpu.memory_space<vmem>>, vector<8x512xbf16>
    %168 = arith.extf %167 : vector<8x512xbf16> to vector<8x512xf32>
    %c0_63 = arith.constant 0 : index
    %c0_64 = arith.constant 0 : index
    %169 = vector.load %arg4[%c0_63, %c0_64] : memref<8x128xf32, #tpu.memory_space<vmem>>, vector<8x128xf32>
    %170 = arith.truncf %169 : vector<8x128xf32> to vector<8x128xbf16>
    %cst_65 = arith.constant dense<0.000000e+00> : vector<8x512xf32>
    %171 = tpu.matmul %170, %3, %cst_65 {dimension_numbers = #tpu.dot_dimension_numbers<[1], [0], [0], [1], [0, 0, 1, 1], [], []>} : vector<8x128xbf16>, vector<128x512xbf16>, vector<8x512xf32> -> vector<8x512xf32>
    %172 = arith.addf %168, %171 : vector<8x512xf32>
    %173 = vector.extract_strided_slice %172 {offsets = [0, 0], sizes = [8, 128], strides = [1, 1]} : vector<8x512xf32> to vector<8x128xf32>
    %174 = arith.negf %173 : vector<8x128xf32>
    %175 = math.exp %174 : vector<8x128xf32>
    %cst_66 = arith.constant 1.000000e+00 : f32
    %176 = vector.broadcast %cst_66 : f32 to vector<8x128xf32>
    %177 = arith.addf %176, %175 : vector<8x128xf32>
    %178 = arith.divf %176, %177 : vector<8x128xf32>
    %179 = vector.extract_strided_slice %172 {offsets = [0, 128], sizes = [8, 128], strides = [1, 1]} : vector<8x512xf32> to vector<8x128xf32>
    %180 = arith.negf %179 : vector<8x128xf32>
    %181 = math.exp %180 : vector<8x128xf32>
    %cst_67 = arith.constant 1.000000e+00 : f32
    %182 = vector.broadcast %cst_67 : f32 to vector<8x128xf32>
    %183 = arith.addf %182, %181 : vector<8x128xf32>
    %184 = arith.divf %182, %183 : vector<8x128xf32>
    %185 = vector.extract_strided_slice %172 {offsets = [0, 256], sizes = [8, 128], strides = [1, 1]} : vector<8x512xf32> to vector<8x128xf32>
    %186 = math.tanh %185 : vector<8x128xf32>
    %187 = vector.extract_strided_slice %172 {offsets = [0, 384], sizes = [8, 128], strides = [1, 1]} : vector<8x512xf32> to vector<8x128xf32>
    %188 = arith.negf %187 : vector<8x128xf32>
    %189 = math.exp %188 : vector<8x128xf32>
    %cst_68 = arith.constant 1.000000e+00 : f32
    %190 = vector.broadcast %cst_68 : f32 to vector<8x128xf32>
    %191 = arith.addf %190, %189 : vector<8x128xf32>
    %192 = arith.divf %190, %191 : vector<8x128xf32>
    %c0_69 = arith.constant 0 : index
    %c0_70 = arith.constant 0 : index
    %193 = vector.load %arg5[%c0_69, %c0_70] : memref<8x128xf32, #tpu.memory_space<vmem>>, vector<8x128xf32>
    %194 = arith.mulf %184, %193 : vector<8x128xf32>
    %195 = arith.mulf %178, %186 : vector<8x128xf32>
    %196 = arith.addf %194, %195 : vector<8x128xf32>
    %197 = math.tanh %196 : vector<8x128xf32>
    %198 = arith.mulf %192, %197 : vector<8x128xf32>
    %c0_71 = arith.constant 0 : index
    %c0_72 = arith.constant 0 : index
    %199 = vector.load %arg5[%c0_71, %c0_72] : memref<8x128xf32, #tpu.memory_space<vmem>>, vector<8x128xf32>
    tpu.vector_store %arg5[%c0_71, %c0_72], %196 {strides = array<i32>} : memref<8x128xf32, #tpu.memory_space<vmem>>, vector<8x128xf32>,
    %c0_73 = arith.constant 0 : index
    %c0_74 = arith.constant 0 : index
    %200 = vector.load %arg4[%c0_73, %c0_74] : memref<8x128xf32, #tpu.memory_space<vmem>>, vector<8x128xf32>
    tpu.vector_store %arg4[%c0_73, %c0_74], %198 {strides = array<i32>} : memref<8x128xf32, #tpu.memory_space<vmem>>, vector<8x128xf32>,
    %201 = arith.truncf %198 : vector<8x128xf32> to vector<8x128xbf16>
    %202 = arith.index_cast %165 : i32 to index
    %c0_75 = arith.constant 0 : index
    %203 = vector.load %arg3[%202, %c0_75] : memref<64x128xbf16, #tpu.memory_space<vmem>>, vector<8x128xbf16>
    tpu.vector_store %arg3[%202, %c0_75], %201 {strides = array<i32>} : memref<64x128xbf16, #tpu.memory_space<vmem>>, vector<8x128xbf16>,
    %c5_i32 = arith.constant 5 : i32
    %c8_i32_76 = arith.constant 8 : i32
    %204 = arith.muli %c5_i32, %c8_i32_76 : i32
    %205 = tpu.assume_multiple %204, 8 : i32
    %206 = arith.index_cast %205 : i32 to index
    %c0_77 = arith.constant 0 : index
    %207 = vector.load %arg1[%206, %c0_77] : memref<64x512xbf16, #tpu.memory_space<vmem>>, vector<8x512xbf16>
    %208 = arith.extf %207 : vector<8x512xbf16> to vector<8x512xf32>
    %c0_78 = arith.constant 0 : index
    %c0_79 = arith.constant 0 : index
    %209 = vector.load %arg4[%c0_78, %c0_79] : memref<8x128xf32, #tpu.memory_space<vmem>>, vector<8x128xf32>
    %210 = arith.truncf %209 : vector<8x128xf32> to vector<8x128xbf16>
    %cst_80 = arith.constant dense<0.000000e+00> : vector<8x512xf32>
    %211 = tpu.matmul %210, %3, %cst_80 {dimension_numbers = #tpu.dot_dimension_numbers<[1], [0], [0], [1], [0, 0, 1, 1], [], []>} : vector<8x128xbf16>, vector<128x512xbf16>, vector<8x512xf32> -> vector<8x512xf32>
    %212 = arith.addf %208, %211 : vector<8x512xf32>
    %213 = vector.extract_strided_slice %212 {offsets = [0, 0], sizes = [8, 128], strides = [1, 1]} : vector<8x512xf32> to vector<8x128xf32>
    %214 = arith.negf %213 : vector<8x128xf32>
    %215 = math.exp %214 : vector<8x128xf32>
    %cst_81 = arith.constant 1.000000e+00 : f32
    %216 = vector.broadcast %cst_81 : f32 to vector<8x128xf32>
    %217 = arith.addf %216, %215 : vector<8x128xf32>
    %218 = arith.divf %216, %217 : vector<8x128xf32>
    %219 = vector.extract_strided_slice %212 {offsets = [0, 128], sizes = [8, 128], strides = [1, 1]} : vector<8x512xf32> to vector<8x128xf32>
    %220 = arith.negf %219 : vector<8x128xf32>
    %221 = math.exp %220 : vector<8x128xf32>
    %cst_82 = arith.constant 1.000000e+00 : f32
    %222 = vector.broadcast %cst_82 : f32 to vector<8x128xf32>
    %223 = arith.addf %222, %221 : vector<8x128xf32>
    %224 = arith.divf %222, %223 : vector<8x128xf32>
    %225 = vector.extract_strided_slice %212 {offsets = [0, 256], sizes = [8, 128], strides = [1, 1]} : vector<8x512xf32> to vector<8x128xf32>
    %226 = math.tanh %225 : vector<8x128xf32>
    %227 = vector.extract_strided_slice %212 {offsets = [0, 384], sizes = [8, 128], strides = [1, 1]} : vector<8x512xf32> to vector<8x128xf32>
    %228 = arith.negf %227 : vector<8x128xf32>
    %229 = math.exp %228 : vector<8x128xf32>
    %cst_83 = arith.constant 1.000000e+00 : f32
    %230 = vector.broadcast %cst_83 : f32 to vector<8x128xf32>
    %231 = arith.addf %230, %229 : vector<8x128xf32>
    %232 = arith.divf %230, %231 : vector<8x128xf32>
    %c0_84 = arith.constant 0 : index
    %c0_85 = arith.constant 0 : index
    %233 = vector.load %arg5[%c0_84, %c0_85] : memref<8x128xf32, #tpu.memory_space<vmem>>, vector<8x128xf32>
    %234 = arith.mulf %224, %233 : vector<8x128xf32>
    %235 = arith.mulf %218, %226 : vector<8x128xf32>
    %236 = arith.addf %234, %235 : vector<8x128xf32>
    %237 = math.tanh %236 : vector<8x128xf32>
    %238 = arith.mulf %232, %237 : vector<8x128xf32>
    %c0_86 = arith.constant 0 : index
    %c0_87 = arith.constant 0 : index
    %239 = vector.load %arg5[%c0_86, %c0_87] : memref<8x128xf32, #tpu.memory_space<vmem>>, vector<8x128xf32>
    tpu.vector_store %arg5[%c0_86, %c0_87], %236 {strides = array<i32>} : memref<8x128xf32, #tpu.memory_space<vmem>>, vector<8x128xf32>,
    %c0_88 = arith.constant 0 : index
    %c0_89 = arith.constant 0 : index
    %240 = vector.load %arg4[%c0_88, %c0_89] : memref<8x128xf32, #tpu.memory_space<vmem>>, vector<8x128xf32>
    tpu.vector_store %arg4[%c0_88, %c0_89], %238 {strides = array<i32>} : memref<8x128xf32, #tpu.memory_space<vmem>>, vector<8x128xf32>,
    %241 = arith.truncf %238 : vector<8x128xf32> to vector<8x128xbf16>
    %242 = arith.index_cast %205 : i32 to index
    %c0_90 = arith.constant 0 : index
    %243 = vector.load %arg3[%242, %c0_90] : memref<64x128xbf16, #tpu.memory_space<vmem>>, vector<8x128xbf16>
    tpu.vector_store %arg3[%242, %c0_90], %241 {strides = array<i32>} : memref<64x128xbf16, #tpu.memory_space<vmem>>, vector<8x128xbf16>,
    %c6_i32 = arith.constant 6 : i32
    %c8_i32_91 = arith.constant 8 : i32
    %244 = arith.muli %c6_i32, %c8_i32_91 : i32
    %245 = tpu.assume_multiple %244, 8 : i32
    %246 = arith.index_cast %245 : i32 to index
    %c0_92 = arith.constant 0 : index
    %247 = vector.load %arg1[%246, %c0_92] : memref<64x512xbf16, #tpu.memory_space<vmem>>, vector<8x512xbf16>
    %248 = arith.extf %247 : vector<8x512xbf16> to vector<8x512xf32>
    %c0_93 = arith.constant 0 : index
    %c0_94 = arith.constant 0 : index
    %249 = vector.load %arg4[%c0_93, %c0_94] : memref<8x128xf32, #tpu.memory_space<vmem>>, vector<8x128xf32>
    %250 = arith.truncf %249 : vector<8x128xf32> to vector<8x128xbf16>
    %cst_95 = arith.constant dense<0.000000e+00> : vector<8x512xf32>
    %251 = tpu.matmul %250, %3, %cst_95 {dimension_numbers = #tpu.dot_dimension_numbers<[1], [0], [0], [1], [0, 0, 1, 1], [], []>} : vector<8x128xbf16>, vector<128x512xbf16>, vector<8x512xf32> -> vector<8x512xf32>
    %252 = arith.addf %248, %251 : vector<8x512xf32>
    %253 = vector.extract_strided_slice %252 {offsets = [0, 0], sizes = [8, 128], strides = [1, 1]} : vector<8x512xf32> to vector<8x128xf32>
    %254 = arith.negf %253 : vector<8x128xf32>
    %255 = math.exp %254 : vector<8x128xf32>
    %cst_96 = arith.constant 1.000000e+00 : f32
    %256 = vector.broadcast %cst_96 : f32 to vector<8x128xf32>
    %257 = arith.addf %256, %255 : vector<8x128xf32>
    %258 = arith.divf %256, %257 : vector<8x128xf32>
    %259 = vector.extract_strided_slice %252 {offsets = [0, 128], sizes = [8, 128], strides = [1, 1]} : vector<8x512xf32> to vector<8x128xf32>
    %260 = arith.negf %259 : vector<8x128xf32>
    %261 = math.exp %260 : vector<8x128xf32>
    %cst_97 = arith.constant 1.000000e+00 : f32
    %262 = vector.broadcast %cst_97 : f32 to vector<8x128xf32>
    %263 = arith.addf %262, %261 : vector<8x128xf32>
    %264 = arith.divf %262, %263 : vector<8x128xf32>
    %265 = vector.extract_strided_slice %252 {offsets = [0, 256], sizes = [8, 128], strides = [1, 1]} : vector<8x512xf32> to vector<8x128xf32>
    %266 = math.tanh %265 : vector<8x128xf32>
    %267 = vector.extract_strided_slice %252 {offsets = [0, 384], sizes = [8, 128], strides = [1, 1]} : vector<8x512xf32> to vector<8x128xf32>
    %268 = arith.negf %267 : vector<8x128xf32>
    %269 = math.exp %268 : vector<8x128xf32>
    %cst_98 = arith.constant 1.000000e+00 : f32
    %270 = vector.broadcast %cst_98 : f32 to vector<8x128xf32>
    %271 = arith.addf %270, %269 : vector<8x128xf32>
    %272 = arith.divf %270, %271 : vector<8x128xf32>
    %c0_99 = arith.constant 0 : index
    %c0_100 = arith.constant 0 : index
    %273 = vector.load %arg5[%c0_99, %c0_100] : memref<8x128xf32, #tpu.memory_space<vmem>>, vector<8x128xf32>
    %274 = arith.mulf %264, %273 : vector<8x128xf32>
    %275 = arith.mulf %258, %266 : vector<8x128xf32>
    %276 = arith.addf %274, %275 : vector<8x128xf32>
    %277 = math.tanh %276 : vector<8x128xf32>
    %278 = arith.mulf %272, %277 : vector<8x128xf32>
    %c0_101 = arith.constant 0 : index
    %c0_102 = arith.constant 0 : index
    %279 = vector.load %arg5[%c0_101, %c0_102] : memref<8x128xf32, #tpu.memory_space<vmem>>, vector<8x128xf32>
    tpu.vector_store %arg5[%c0_101, %c0_102], %276 {strides = array<i32>} : memref<8x128xf32, #tpu.memory_space<vmem>>, vector<8x128xf32>,
    %c0_103 = arith.constant 0 : index
    %c0_104 = arith.constant 0 : index
    %280 = vector.load %arg4[%c0_103, %c0_104] : memref<8x128xf32, #tpu.memory_space<vmem>>, vector<8x128xf32>
    tpu.vector_store %arg4[%c0_103, %c0_104], %278 {strides = array<i32>} : memref<8x128xf32, #tpu.memory_space<vmem>>, vector<8x128xf32>,
    %281 = arith.truncf %278 : vector<8x128xf32> to vector<8x128xbf16>
    %282 = arith.index_cast %245 : i32 to index
    %c0_105 = arith.constant 0 : index
    %283 = vector.load %arg3[%282, %c0_105] : memref<64x128xbf16, #tpu.memory_space<vmem>>, vector<8x128xbf16>
    tpu.vector_store %arg3[%282, %c0_105], %281 {strides = array<i32>} : memref<64x128xbf16, #tpu.memory_space<vmem>>, vector<8x128xbf16>,
    %c7_i32 = arith.constant 7 : i32
    %c8_i32_106 = arith.constant 8 : i32
    %284 = arith.muli %c7_i32, %c8_i32_106 : i32
    %285 = tpu.assume_multiple %284, 8 : i32
    %286 = arith.index_cast %285 : i32 to index
    %c0_107 = arith.constant 0 : index
    %287 = vector.load %arg1[%286, %c0_107] : memref<64x512xbf16, #tpu.memory_space<vmem>>, vector<8x512xbf16>
    %288 = arith.extf %287 : vector<8x512xbf16> to vector<8x512xf32>
    %c0_108 = arith.constant 0 : index
    %c0_109 = arith.constant 0 : index
    %289 = vector.load %arg4[%c0_108, %c0_109] : memref<8x128xf32, #tpu.memory_space<vmem>>, vector<8x128xf32>
    %290 = arith.truncf %289 : vector<8x128xf32> to vector<8x128xbf16>
    %cst_110 = arith.constant dense<0.000000e+00> : vector<8x512xf32>
    %291 = tpu.matmul %290, %3, %cst_110 {dimension_numbers = #tpu.dot_dimension_numbers<[1], [0], [0], [1], [0, 0, 1, 1], [], []>} : vector<8x128xbf16>, vector<128x512xbf16>, vector<8x512xf32> -> vector<8x512xf32>
    %292 = arith.addf %288, %291 : vector<8x512xf32>
    %293 = vector.extract_strided_slice %292 {offsets = [0, 0], sizes = [8, 128], strides = [1, 1]} : vector<8x512xf32> to vector<8x128xf32>
    %294 = arith.negf %293 : vector<8x128xf32>
    %295 = math.exp %294 : vector<8x128xf32>
    %cst_111 = arith.constant 1.000000e+00 : f32
    %296 = vector.broadcast %cst_111 : f32 to vector<8x128xf32>
    %297 = arith.addf %296, %295 : vector<8x128xf32>
    %298 = arith.divf %296, %297 : vector<8x128xf32>
    %299 = vector.extract_strided_slice %292 {offsets = [0, 128], sizes = [8, 128], strides = [1, 1]} : vector<8x512xf32> to vector<8x128xf32>
    %300 = arith.negf %299 : vector<8x128xf32>
    %301 = math.exp %300 : vector<8x128xf32>
    %cst_112 = arith.constant 1.000000e+00 : f32
    %302 = vector.broadcast %cst_112 : f32 to vector<8x128xf32>
    %303 = arith.addf %302, %301 : vector<8x128xf32>
    %304 = arith.divf %302, %303 : vector<8x128xf32>
    %305 = vector.extract_strided_slice %292 {offsets = [0, 256], sizes = [8, 128], strides = [1, 1]} : vector<8x512xf32> to vector<8x128xf32>
    %306 = math.tanh %305 : vector<8x128xf32>
    %307 = vector.extract_strided_slice %292 {offsets = [0, 384], sizes = [8, 128], strides = [1, 1]} : vector<8x512xf32> to vector<8x128xf32>
    %308 = arith.negf %307 : vector<8x128xf32>
    %309 = math.exp %308 : vector<8x128xf32>
    %cst_113 = arith.constant 1.000000e+00 : f32
    %310 = vector.broadcast %cst_113 : f32 to vector<8x128xf32>
    %311 = arith.addf %310, %309 : vector<8x128xf32>
    %312 = arith.divf %310, %311 : vector<8x128xf32>
    %c0_114 = arith.constant 0 : index
    %c0_115 = arith.constant 0 : index
    %313 = vector.load %arg5[%c0_114, %c0_115] : memref<8x128xf32, #tpu.memory_space<vmem>>, vector<8x128xf32>
    %314 = arith.mulf %304, %313 : vector<8x128xf32>
    %315 = arith.mulf %298, %306 : vector<8x128xf32>
    %316 = arith.addf %314, %315 : vector<8x128xf32>
    %317 = math.tanh %316 : vector<8x128xf32>
    %318 = arith.mulf %312, %317 : vector<8x128xf32>
    %c0_116 = arith.constant 0 : index
    %c0_117 = arith.constant 0 : index
    %319 = vector.load %arg5[%c0_116, %c0_117] : memref<8x128xf32, #tpu.memory_space<vmem>>, vector<8x128xf32>
    tpu.vector_store %arg5[%c0_116, %c0_117], %316 {strides = array<i32>} : memref<8x128xf32, #tpu.memory_space<vmem>>, vector<8x128xf32>,
    %c0_118 = arith.constant 0 : index
    %c0_119 = arith.constant 0 : index
    %320 = vector.load %arg4[%c0_118, %c0_119] : memref<8x128xf32, #tpu.memory_space<vmem>>, vector<8x128xf32>
    tpu.vector_store %arg4[%c0_118, %c0_119], %318 {strides = array<i32>} : memref<8x128xf32, #tpu.memory_space<vmem>>, vector<8x128xf32>,
    %321 = arith.truncf %318 : vector<8x128xf32> to vector<8x128xbf16>
    %322 = arith.index_cast %285 : i32 to index
    %c0_120 = arith.constant 0 : index
    %323 = vector.load %arg3[%322, %c0_120] : memref<64x128xbf16, #tpu.memory_space<vmem>>, vector<8x128xbf16>
    tpu.vector_store %arg3[%322, %c0_120], %321 {strides = array<i32>} : memref<64x128xbf16, #tpu.memory_space<vmem>>, vector<8x128xbf16>,
    %c8_i32_121 = arith.constant 8 : i32
    return
  }
  func.func @transform_0(%arg0: i32) -> (i32, i32) {
    %c0_i32 = arith.constant 0 : i32
    %c0_i32_0 = arith.constant 0 : i32
    return %arg0, %c0_i32 : i32, i32
  }
  func.func @transform_1(%arg0: i32) -> (i32, i32) {
    %c0_i32 = arith.constant 0 : i32
    %c0_i32_0 = arith.constant 0 : i32
    %c0_i32_1 = arith.constant 0 : i32
    return %c0_i32, %c0_i32_0 : i32, i32
  }
  func.func @transform_2(%arg0: i32) -> (i32, i32) {
    %c0_i32 = arith.constant 0 : i32
    %c0_i32_0 = arith.constant 0 : i32
    return %arg0, %c0_i32 : i32, i32
  }
}

</mosaic_0001>

<bundles_post_ra>
// kernel: tpu_custom_call.1
= control target key start
LH: loop header
LB: loop body
LE: loop exit
PB: predicated region body
PF: predicated region fallthrough
CT: control target
= control target key end

     0   :  { %7 = vsyncpa [#allocation5], 0  ;;  %s2134_s0 = inlined_call_operand.hbm [shape: bf16[64,512], index: 0, kind: input, shape index: {}]   ;;  %s2135_s1 = inlined_call_operand.hbm [shape: bf16[128,512], index: 1, kind: input, shape index: {}]   ;;  %s2136_s2 = inlined_call_operand.hbm [shape: bf16[64,128], index: 2, kind: output, shape index: {}]  }
   0x1   :  { %8 = vsyncpa [#allocation8], 0 }
   0x2   :  { %9 = vsyncpa [#allocation6], 0  ;;  %s14_s11 = sshll.u32 %s2134_s0, 4  ;;  %s1754_s12 = smov [#allocation4]   ;;  %s15_s11 = int_to_ptr.hbm [resolvable:$true] %s14_s11 }
   0x3   :  { %s16_s13 = sshll.u32 %s1754_s12, 4  ;;  %s27_s16 = sshll.u32 %s2135_s1, 4  ;;  %s17_s13 = int_to_ptr.vmem [resolvable:$true] %s16_s13  ;;  %s28_s16 = int_to_ptr.hbm [resolvable:$true] %s27_s16 }
   0x4   :  { %s1755_s17 = smov 256   ;;  %s1756_s18 = smov 16  }
   0x5   :  { %22 = dma.hbm_to_vmem [thread:$0]  %s15_s11, 2048, %s17_s13, [#allocation5], %s1755_s17, %s1755_s17, %s1756_s18  }
   0x6   :  { %s1757_s19 = smov [#allocation7]  }
   0x7   :  { %s29_s20 = sshll.u32 %s1757_s19, 4  ;;  %s30_s20 = int_to_ptr.vmem [resolvable:$true] %s29_s20 }
   0x8   :  { %35 = dma.hbm_to_vmem [thread:$0]  %s28_s16, 4096, %s30_s20, [#allocation8], %s1755_s17, %s1755_s17, %s1756_s18  }
   0x9   :  { %1748 = dma.done.wait [#allocation5], 2048  }
   0xa   :  { %1749 = vsyncadd [#allocation5], 4294965248 }
   0xb   :  { %1750 = dma.done.wait [#allocation8], 4096  }
   0xc   :  { %1751 = vsyncadd [#allocation8], 4294963200  ;;  %v1470_v0 = vld [vmem:[#allocation7 + $0xe0] sm:$0xf]  ;;  %v1538_v1 = vld [vmem:[#allocation7 + $0xec] sm:$0xf0] }
   0xd   :  { %v1536_v2 = vld [vmem:[#allocation7 + $0xe4] sm:$0xf]  ;;  %v1783_v3 = vor.u32 %v1538_v1, %v1470_v0  ;;  %v1472_v4 = vld [vmem:[#allocation7 + $0xf0] sm:$0xf0]  ;;  %v1537_v5 = vld [vmem:[#allocation7 + $0xec] sm:$0xf] }
   0xe   :  { %v1480_v6 = vld [vmem:[#allocation7 + $0xf8] sm:$0xf0]  ;;  %v1785_v7 = vor.u32 %v1536_v2, %v1472_v4  ;;  %v1454_v9 = vld [vmem:[#allocation7 + $0xc0] sm:$0xf]  ;;  %v1534_v10 = vld [vmem:[#allocation7 + $0xcc] sm:$0xf0] }
   0xf   :  { %v1787_v8 = vor.u32 %v1537_v5, %v1480_v6  ;;  %v1532_v11 = vld [vmem:[#allocation7 + $0xc4] sm:$0xf]  ;;  %253 = vmatpush.bf16.msra.mxu0 %v1783_v3  ;;  %v1790_v12 = vor.u32 %v1534_v10, %v1454_v9  ;;  %v1456_v13 = vld [vmem:[#allocation7 + $0xd0] sm:$0xf0]  ;;  %v1533_v14 = vld [vmem:[#allocation7 + $0xcc] sm:$0xf] }
  0x10   :  { %v1464_v15 = vld [vmem:[#allocation7 + $0xd8] sm:$0xf0]  ;;  %266 = vmatpush.bf16.msra.mxu1 %v1785_v7  ;;  %v1794_v16 = vor.u32 %v1532_v11, %v1456_v13  ;;  %v1478_v18 = vld [vmem:[#allocation7 + $0xe8] sm:$0xf]  ;;  %v1539_v19 = vld [vmem:[#allocation7 + $0xf4] sm:$0xf0] }
  0x11   :  { %292 = vmatpush.bf16.msra.mxu3 %v1787_v8  ;;  %v1796_v17 = vor.u32 %v1533_v14, %v1464_v15  ;;  %v1438_v20 = vld [vmem:[#allocation7 + $0xa0] sm:$0xf]  ;;  %v1798_v21 = vor.u32 %v1539_v19, %v1478_v18  ;;  %v1530_v22 = vld [vmem:[#allocation7 + $0xac] sm:$0xf0]  ;;  %v1528_v23 = vld [vmem:[#allocation7 + $0xa4] sm:$0xf] }
  0x12   :  { %v1440_v24 = vld [vmem:[#allocation7 + $0xb0] sm:$0xf0]  ;;  %v1529_v25 = vld [vmem:[#allocation7 + $0xac] sm:$0xf]  ;;  %v1448_v26 = vld [vmem:[#allocation7 + $0xb8] sm:$0xf0]  ;;  %v1802_v28 = vor.u32 %v1530_v22, %v1438_v20 }
  0x13   :  { %v1462_v27 = vld [vmem:[#allocation7 + $0xc8] sm:$0xf]  ;;  %254 = vmatpush.bf16.msra.mxu0 %v1790_v12  ;;  %279 = vmatpush.bf16.msra.mxu2 %v1798_v21  ;;  %v1535_v29 = vld [vmem:[#allocation7 + $0xd4] sm:$0xf0]  ;;  %v1422_v30 = vld [vmem:[#allocation7 + $0x80] sm:$0xf]  ;;  %v1806_v32 = vor.u32 %v1528_v23, %v1440_v24  ;;  %v1808_v33 = vor.u32 %v1529_v25, %v1448_v26 }
  0x14   :  { %v1526_v31 = vld [vmem:[#allocation7 + $0x8c] sm:$0xf0]  ;;  %267 = vmatpush.bf16.msra.mxu1 %v1794_v16  ;;  %v1810_v34 = vor.u32 %v1535_v29, %v1462_v27  ;;  %v1524_v35 = vld [vmem:[#allocation7 + $0x84] sm:$0xf]  ;;  %v1424_v36 = vld [vmem:[#allocation7 + $0x90] sm:$0xf0] }
  0x15   :  { %293 = vmatpush.bf16.msra.mxu3 %v1796_v17  ;;  %v1525_v37 = vld [vmem:[#allocation7 + $0x8c] sm:$0xf]  ;;  %v1432_v38 = vld [vmem:[#allocation7 + $0x98] sm:$0xf0]  ;;  %v1446_v39 = vld [vmem:[#allocation7 + $0xa8] sm:$0xf]  ;;  %v1814_v41 = vor.u32 %v1526_v31, %v1422_v30  ;;  %v1820_v45 = vor.u32 %v1524_v35, %v1424_v36 }
  0x16   :  { %v1531_v40 = vld [vmem:[#allocation7 + $0xb4] sm:$0xf0]  ;;  %v1406_v43 = vld [vmem:[#allocation7 + $0x60] sm:$0xf]  ;;  %v1522_v44 = vld [vmem:[#allocation7 + $0x6c] sm:$0xf0]  ;;  %v1822_v46 = vor.u32 %v1525_v37, %v1432_v38 }
  0x17   :  { %255 = vmatpush.bf16.msra.mxu0 %v1802_v28  ;;  %280 = vmatpush.bf16.msra.mxu2 %v1810_v34  ;;  %v1816_v42 = vor.u32 %v1531_v40, %v1446_v39  ;;  %v1520_v47 = vld [vmem:[#allocation7 + $0x64] sm:$0xf]  ;;  %v1430_v48 = vld [vmem:[#allocation7 + $0x88] sm:$0xf]  ;;  %v1527_v49 = vld [vmem:[#allocation7 + $0x94] sm:$0xf0]  ;;  %v1826_v53 = vor.u32 %v1522_v44, %v1406_v43 }
  0x18   :  { %268 = vmatpush.bf16.msra.mxu1 %v1806_v32  ;;  %v1408_v50 = vld [vmem:[#allocation7 + $0x70] sm:$0xf0]  ;;  %v1521_v51 = vld [vmem:[#allocation7 + $0x6c] sm:$0xf]  ;;  %v1416_v52 = vld [vmem:[#allocation7 + $0x78] sm:$0xf0]  ;;  %v1828_v54 = vor.u32 %v1527_v49, %v1430_v48 }
  0x19   :  { %294 = vmatpush.bf16.msra.mxu3 %v1808_v33  ;;  %v1390_v55 = vld [vmem:[#allocation7 + $0x40] sm:$0xf]  ;;  %v1518_v56 = vld [vmem:[#allocation7 + $0x4c] sm:$0xf0]  ;;  %v1832_v57 = vor.u32 %v1520_v47, %v1408_v50  ;;  %v1834_v58 = vor.u32 %v1521_v51, %v1416_v52  ;;  %v1516_v59 = vld [vmem:[#allocation7 + $0x44] sm:$0xf] }
  0x1a   :  { %v1414_v60 = vld [vmem:[#allocation7 + $0x68] sm:$0xf]  ;;  %v1523_v61 = vld [vmem:[#allocation7 + $0x74] sm:$0xf0]  ;;  %v1392_v62 = vld [vmem:[#allocation7 + $0x50] sm:$0xf0]  ;;  %v1838_v1 = vor.u32 %v1518_v56, %v1390_v55 }
  0x1b   :  { %256 = vmatpush.bf16.msra.mxu0 %v1814_v41  ;;  %281 = vmatpush.bf16.msra.mxu2 %v1816_v42  ;;  %v1517_v63 = vld [vmem:[#allocation7 + $0x4c] sm:$0xf]  ;;  %v1400_v0 = vld [vmem:[#allocation7 + $0x58] sm:$0xf0]  ;;  %v1840_v2 = vor.u32 %v1523_v61, %v1414_v60  ;;  %v1374_v4 = vld [vmem:[#allocation7 + $0x20] sm:$0xf]  ;;  %v1844_v6 = vor.u32 %v1516_v59, %v1392_v62 }
  0x1c   :  { %269 = vmatpush.bf16.msra.mxu1 %v1820_v45  ;;  %v1514_v5 = vld [vmem:[#allocation7 + $0x2c] sm:$0xf0]  ;;  %v1846_v9 = vor.u32 %v1517_v63, %v1400_v0  ;;  %v1512_v10 = vld [vmem:[#allocation7 + $0x24] sm:$0xf]  ;;  %v1398_v11 = vld [vmem:[#allocation7 + $0x48] sm:$0xf] }
  0x1d   :  { %295 = vmatpush.bf16.msra.mxu3 %v1822_v46  ;;  %v1519_v13 = vld [vmem:[#allocation7 + $0x54] sm:$0xf0]  ;;  %v1376_v14 = vld [vmem:[#allocation7 + $0x30] sm:$0xf0]  ;;  %v1513_v15 = vld [vmem:[#allocation7 + $0x2c] sm:$0xf]  ;;  %v1850_v19 = vor.u32 %v1514_v5, %v1374_v4 }
  0x1e   :  { %v1384_v18 = vld [vmem:[#allocation7 + $0x38] sm:$0xf0]  ;;  %v1852_v20 = vor.u32 %v1519_v13, %v1398_v11  ;;  %v1358_v22 = vld [vmem:[#allocation7] sm:$0xf]  ;;  %v1510_v23 = vld [vmem:[#allocation7 + $0xc] sm:$0xf0]  ;;  %v1856_v24 = vor.u32 %v1512_v10, %v1376_v14 }
  0x1f   :  { %257 = vmatpush.bf16.msra.mxu0 %v1826_v53  ;;  %282 = vmatpush.bf16.msra.mxu2 %v1828_v54  ;;  %v1858_v25 = vor.u32 %v1513_v15, %v1384_v18  ;;  %v1508_v26 = vld [vmem:[#allocation7 + $0x4] sm:$0xf]  ;;  %v1382_v27 = vld [vmem:[#allocation7 + $0x28] sm:$0xf]  ;;  %v1515_v29 = vld [vmem:[#allocation7 + $0x34] sm:$0xf0]  ;;  %v1862_v36 = vor.u32 %v1510_v23, %v1358_v22 }
  0x20   :  { %270 = vmatpush.bf16.msra.mxu1 %v1832_v57  ;;  %v1360_v30 = vld [vmem:[#allocation7 + $0x10] sm:$0xf0]  ;;  %v1509_v31 = vld [vmem:[#allocation7 + $0xc] sm:$0xf]  ;;  %v1368_v35 = vld [vmem:[#allocation7 + $0x18] sm:$0xf0]  ;;  %v1864_v37 = vor.u32 %v1515_v29, %v1382_v27 }
  0x21   :  { %296 = vmatpush.bf16.msra.mxu3 %v1834_v58  ;;  %v1868_v38 = vor.u32 %v1508_v26, %v1360_v30  ;;  %v1870_v39 = vor.u32 %v1509_v31, %v1368_v35  ;;  %v1366_v40 = vld [vmem:[#allocation7 + $0x8] sm:$0xf]  ;;  %v1511_v43 = vld [vmem:[#allocation7 + $0x14] sm:$0xf0]  ;;  %v1758_v47 = vmov 0.0|0.0   ;;  %v85_v48 = vld [vmem:[#allocation4] sm:$0xff] }
  0x22   :  { %v1876_v44 = vor.u32 %v1511_v43, %v1366_v40  ;;  %v87_v49 = vunpack.c.l.bf16 %v85_v48  ;;  %v88_v50 = vunpack.c.h.bf16 %v85_v48  ;;  %v86_v56 = vld [vmem:[#allocation4 + $0x8] sm:$0xff]  ;;  %s1759_s0 = smov [#allocation9]   ;;  %s1335_s23 = sshll.u32 %s2136_s2, 4  ;;  %s1336_s23 = int_to_ptr.hbm [resolvable:$true] %s1335_s23 }
  0x23   :  { %258 = vmatpush.bf16.msra.mxu0 %v1838_v1  ;;  %283 = vmatpush.bf16.msra.mxu2 %v1840_v2  ;;  %v90_v62 = vunpack.c.h.bf16 %v86_v56  ;;  %v89_v22 = vunpack.c.l.bf16 %v86_v56  ;;  %s1333_s1 = sshll.u32 %s1759_s0, 4  ;;  %s1760_s24 = smov 64   ;;  %s1334_s1 = int_to_ptr.vmem [resolvable:$true] %s1333_s1 }
  0x24   :  { %271 = vmatpush.bf16.msra.mxu1 %v1844_v6  ;;  %s1761_s25 = smov 4  }
  0x25   :  { %297 = vmatpush.bf16.msra.mxu3 %v1846_v9 }
  0x27   :  { %259 = vmatpush.bf16.msra.mxu0 %v1850_v19  ;;  %284 = vmatpush.bf16.msra.mxu2 %v1852_v20 }
  0x28   :  { %272 = vmatpush.bf16.msra.mxu1 %v1856_v24 }
  0x29   :  { %298 = vmatpush.bf16.msra.mxu3 %v1858_v25 }
  0x2b   :  { %260 = vmatpush.bf16.msra.mxu0 %v1862_v36  ;;  %285 = vmatpush.bf16.msra.mxu2 %v1864_v37 }
  0x2c   :  { %273 = vmatpush.bf16.msra.mxu1 %v1868_v38 }
  0x2d   :  { %299 = vmatpush.bf16.msra.mxu3 %v1870_v39 }
  0x2e   :  { %261 = vmatmul.bf16.vlgmr.msra.gmra.mxu0 %v1758_v47 }
  0x2f   :  { %388 = vmatpush.bf16.msrb.mxu0 %v1783_v3  ;;  %274 = vmatmul.bf16.vlgmr.msra.gmra.mxu1 %v1758_v47 }
  0x30   :  { %401 = vmatpush.bf16.msrb.mxu1 %v1785_v7  ;;  %300 = vmatmul.bf16.vlgmr.msra.gmra.mxu3 %v1758_v47 }
  0x31   :  { %427 = vmatpush.bf16.msrb.mxu3 %v1787_v8  ;;  %286 = vmatpush.bf16.msra.mxu2 %v1876_v44 }
  0x33   :  { %389 = vmatpush.bf16.msrb.mxu0 %v1790_v12 }
  0x34   :  { %402 = vmatpush.bf16.msrb.mxu1 %v1794_v16  ;;  %287 = vmatmul.bf16.vlgmr.msra.gmra.mxu2 %v1758_v47 }
  0x35   :  { %414 = vmatpush.bf16.msrb.mxu2 %v1798_v21  ;;  %428 = vmatpush.bf16.msrb.mxu3 %v1796_v17 }
  0x37   :  { %390 = vmatpush.bf16.msrb.mxu0 %v1802_v28 }
  0x38   :  { %403 = vmatpush.bf16.msrb.mxu1 %v1806_v32 }
  0x39   :  { %415 = vmatpush.bf16.msrb.mxu2 %v1810_v34  ;;  %429 = vmatpush.bf16.msrb.mxu3 %v1808_v33 }
  0x3b   :  { %391 = vmatpush.bf16.msrb.mxu0 %v1814_v41 }
  0x3c   :  { %404 = vmatpush.bf16.msrb.mxu1 %v1820_v45 }
  0x3d   :  { %416 = vmatpush.bf16.msrb.mxu2 %v1816_v42  ;;  %430 = vmatpush.bf16.msrb.mxu3 %v1822_v46 }
  0x3f   :  { %392 = vmatpush.bf16.msrb.mxu0 %v1826_v53 }
  0x40   :  { %405 = vmatpush.bf16.msrb.mxu1 %v1832_v57 }
  0x41   :  { %417 = vmatpush.bf16.msrb.mxu2 %v1828_v54  ;;  %431 = vmatpush.bf16.msrb.mxu3 %v1834_v58 }
  0x43   :  { %393 = vmatpush.bf16.msrb.mxu0 %v1838_v1 }
  0x44   :  { %406 = vmatpush.bf16.msrb.mxu1 %v1844_v6 }
  0x45   :  { %418 = vmatpush.bf16.msrb.mxu2 %v1840_v2  ;;  %432 = vmatpush.bf16.msrb.mxu3 %v1846_v9 }
  0x47   :  { %394 = vmatpush.bf16.msrb.mxu0 %v1850_v19 }
  0x48   :  { %407 = vmatpush.bf16.msrb.mxu1 %v1856_v24 }
  0x49   :  { %419 = vmatpush.bf16.msrb.mxu2 %v1852_v20  ;;  %433 = vmatpush.bf16.msrb.mxu3 %v1858_v25 }
  0x4b   :  { %395 = vmatpush.bf16.msrb.mxu0 %v1862_v36 }
  0x4c   :  { %408 = vmatpush.bf16.msrb.mxu1 %v1868_v38 }
  0x4d   :  { %420 = vmatpush.bf16.msrb.mxu2 %v1864_v37  ;;  %434 = vmatpush.bf16.msrb.mxu3 %v1870_v39 }
  0x4f   :  { %524 = vmatpush.bf16.msra.mxu0 %v1783_v3 }
  0x50   :  { %537 = vmatpush.bf16.msra.mxu1 %v1785_v7 }
  0x51   :  { %563 = vmatpush.bf16.msra.mxu3 %v1787_v8  ;;  %421 = vmatpush.bf16.msrb.mxu2 %v1876_v44 }
  0x53   :  { %525 = vmatpush.bf16.msra.mxu0 %v1790_v12 }
  0x54   :  { %538 = vmatpush.bf16.msra.mxu1 %v1794_v16 }
  0x55   :  { %550 = vmatpush.bf16.msra.mxu2 %v1798_v21  ;;  %564 = vmatpush.bf16.msra.mxu3 %v1796_v17 }
  0x57   :  { %526 = vmatpush.bf16.msra.mxu0 %v1802_v28 }
  0x58   :  { %539 = vmatpush.bf16.msra.mxu1 %v1806_v32 }
  0x59   :  { %551 = vmatpush.bf16.msra.mxu2 %v1810_v34  ;;  %565 = vmatpush.bf16.msra.mxu3 %v1808_v33 }
  0x5b   :  { %527 = vmatpush.bf16.msra.mxu0 %v1814_v41 }
  0x5c   :  { %540 = vmatpush.bf16.msra.mxu1 %v1820_v45 }
  0x5d   :  { %552 = vmatpush.bf16.msra.mxu2 %v1816_v42  ;;  %566 = vmatpush.bf16.msra.mxu3 %v1822_v46 }
  0x5f   :  { %528 = vmatpush.bf16.msra.mxu0 %v1826_v53 }
  0x60   :  { %541 = vmatpush.bf16.msra.mxu1 %v1832_v57 }
  0x61   :  { %553 = vmatpush.bf16.msra.mxu2 %v1828_v54  ;;  %567 = vmatpush.bf16.msra.mxu3 %v1834_v58 }
  0x63   :  { %529 = vmatpush.bf16.msra.mxu0 %v1838_v1 }
  0x64   :  { %542 = vmatpush.bf16.msra.mxu1 %v1844_v6 }
  0x65   :  { %554 = vmatpush.bf16.msra.mxu2 %v1840_v2  ;;  %568 = vmatpush.bf16.msra.mxu3 %v1846_v9 }
  0x67   :  { %530 = vmatpush.bf16.msra.mxu0 %v1850_v19 }
  0x68   :  { %543 = vmatpush.bf16.msra.mxu1 %v1856_v24 }
  0x69   :  { %555 = vmatpush.bf16.msra.mxu2 %v1852_v20  ;;  %569 = vmatpush.bf16.msra.mxu3 %v1858_v25 }
  0x6b   :  { %531 = vmatpush.bf16.msra.mxu0 %v1862_v36 }
  0x6c   :  { %544 = vmatpush.bf16.msra.mxu1 %v1868_v38 }
  0x6d   :  { %556 = vmatpush.bf16.msra.mxu2 %v1864_v37  ;;  %570 = vmatpush.bf16.msra.mxu3 %v1870_v39 }
  0x71   :  { %557 = vmatpush.bf16.msra.mxu2 %v1876_v44 }
  0xab   :  { %v262_v51 = vpop.f32.mrf.mxu0 }
  0xac   :  { %v305_v52 = vadd.f32 %v262_v51, %v87_v49  ;;  %v275_v55 = vpop.f32.mrf.mxu1 }
  0xad   :  { %v306_v59 = vadd.f32 %v275_v55, %v88_v50 }
  0xae   :  { %v1484_v60 = vmul.f32 -1.442695, %v305_v52 }
  0xaf   :  { %v1485_v61 = vmul.f32 -1.442695, %v306_v59 }
  0xb0   :  { %1548 = vpow2.f32 %v1484_v60 }
  0xb1   :  { %1550 = vpow2.f32 %v1485_v61 }
  0xb3   :  { %v301_v63 = vpop.f32.mrf.mxu3  ;;  %v264_v4 = vpop.f32.mrf.mxu0 }
  0xb4   :  { %v308_v0 = vadd.f32 %v301_v63, %v90_v62  ;;  %v277_v5 = vpop.f32.mrf.mxu1 }
  0xb6   :  { %v1486_v10 = vmul.f32 -1.442695, %v308_v0  ;;  %v1549_v11 = vpop.eup %1548 }
  0xb7   :  { %v288_v13 = vpop.f32.mrf.mxu2  ;;  %v1551_v14 = vpop.eup %1550  ;;  %v312_v15 = vadd.f32 1.0, %v1549_v11 }
  0xb8   :  { %1552 = vpow2.f32 %v1486_v10  ;;  %v331_v18 = vadd.f32 1.0, %v1551_v14  ;;  %v307_v27 = vadd.f32 %v288_v13, %v89_v22 }
  0xb9   :  { %1554 = vrcp.f32 %v312_v15  ;;  %v324_v49 = vand.u32 2147483648, %v312_v15  ;;  %v322_v52 = vand.u32 2147483647, %v312_v15  ;;  %vm318_vm2 = vweird.f32 %v312_v15 }
  0xba   :  { %1556 = vrcp.f32 %v331_v18  ;;  %v343_v50 = vand.u32 2147483648, %v331_v18  ;;  %v341_v56 = vand.u32 2147483647, %v331_v18  ;;  %vm337_vm3 = vweird.f32 %v331_v18 }
  0xbb   :  { %v303_v23 = vpop.f32.mrf.mxu3  ;;  %v325_v63 = vor.u32 1.1754944e-38, %v324_v49  ;;  %vm323_vm5 = vcmp.eq.f32.partialorder %v322_v52, 8.507059e+37 }
  0xbc   :  { %v344_v4 = vor.u32 1.1754944e-38, %v343_v50  ;;  %vm342_vm7 = vcmp.eq.f32.partialorder %v341_v56, 8.507059e+37 }
  0xbe   :  { %v1553_v26 = vpop.eup %1552 }
  0xbf   :  { %v351_v29 = vadd.f32 1.0, %v1553_v26  ;;  %v290_v30 = vpop.f32.mrf.mxu2  ;;  %v1555_v31 = vpop.eup %1554 }
  0xc0   :  { %v1557_v35 = vpop.eup %1556  ;;  %v314_v40 = vmul.f32 %v1555_v31, %v312_v15  ;;  %vm319_vm0 = vweird.f32 %v1555_v31 }
  0xc1   :  { %1558 = vrcp.f32 %v351_v29  ;;  %v333_v43 = vmul.f32 %v1557_v35, %v331_v18  ;;  %vm338_vm1 = vweird.f32 %v1557_v35  ;;  %vm320_vm4 = vmor %vm318_vm2, %vm319_vm0  ;;  %v363_v18 = vand.u32 2147483648, %v351_v29 }
  0xc2   :  { %1560 = vtanh.f32 %v307_v27  ;;  %v315_v47 = vsub.f32 1.0, %v314_v40  ;;  %vm339_vm6 = vmor %vm337_vm3, %vm338_vm1  ;;  %vm357_vm9 = vweird.f32 %v351_v29  ;;  %v361_v30 = vand.u32 2147483647, %v351_v29 }
  0xc3   :  { %v334_v48 = vsub.f32 1.0, %v333_v43  ;;  %v364_v40 = vor.u32 1.1754944e-38, %v363_v18 }
  0xc4   :  { %v316_v51 = vmul.f32 %v1555_v31, %v315_v47  ;;  %vm362_vm11 = vcmp.eq.f32.partialorder %v361_v30, 8.507059e+37 }
  0xc5   :  { %v335_v55 = vmul.f32 %v1557_v35, %v334_v48 }
  0xc6   :  { %v317_v60 = vadd.f32 %v1555_v31, %v316_v51 }
  0xc7   :  { %v1559_v59 = vpop.eup %1558  ;;  %v336_v0 = vadd.f32 %v1557_v35, %v335_v55 }
  0xc8   :  { %v1561_v61 = vpop.eup %1560  ;;  %v353_v62 = vmul.f32 %v1559_v59, %v351_v29  ;;  %v321_v5 = vsel %vm320_vm4, %v1555_v31, %v317_v60  ;;  %vm358_vm8 = vweird.f32 %v1559_v59  ;;  %v380_v29 = vld [vmem:[#allocation4 + $0x10] sm:$0xff] }
  0xc9   :  { %v326_v11 = vsel %vm323_vm5, %v325_v63, %v321_v5  ;;  %v340_v13 = vsel %vm339_vm6, %v1557_v35, %v336_v0  ;;  %vm359_vm10 = vmor %vm357_vm9, %vm358_vm8  ;;  %v382_v49 = vunpack.c.l.bf16 %v380_v29  ;;  %v383_v50 = vunpack.c.h.bf16 %v380_v29 }
  0xca   :  { %v354_v10 = vsub.f32 1.0, %v353_v62  ;;  %v345_v14 = vsel %vm342_vm7, %v344_v4, %v340_v13  ;;  %v369_v22 = vmul.f32 %v1561_v61, %v326_v11 }
  0xcb   :  { %v368_v26 = vmul.f32 0.0, %v345_v14 }
  0xcc   :  { %v355_v23 = vmul.f32 %v1559_v59, %v354_v10 }
  0xcd   :  { %v1943_v27 = vadd.f32 %v369_v22, %v368_v26 }
  0xce   :  { %v356_v15 = vadd.f32 %v1559_v59, %v355_v23 }
  0xcf   :  { %1562 = vtanh.f32 %v1943_v27 }
  0xd0   :  { %v360_v31 = vsel %vm359_vm10, %v1559_v59, %v356_v15  ;;  %v381_v59 = vld [vmem:[#allocation4 + $0x18] sm:$0xff] }
  0xd1   :  { %v365_v35 = vsel %vm362_vm11, %v364_v40, %v360_v31  ;;  %v385_v62 = vunpack.c.h.bf16 %v381_v59  ;;  %v384_v18 = vunpack.c.l.bf16 %v381_v59 }
  0xd5   :  { %v1563_v43 = vpop.eup %1562 }
  0xd6   :  { %v372_v47 = vmul.f32 %v1563_v43, %v365_v35 }
  0xd8   :  { %v375_v48 = vpack.c.bf16 %v372_v47, %v372_v47 }
  0xda   :  { %376 = vst [vmem:[#allocation9] sm:$0xf] %v375_v48  ;;  %396 = vmatmul.bf16.vlgmr.msrb.gmra.mxu0 %v375_v48  ;;  %409 = vmatmul.bf16.vlgmr.msrb.gmra.mxu1 %v375_v48 }
  0xdb   :  { %422 = vmatmul.bf16.vlgmr.msrb.gmra.mxu2 %v375_v48  ;;  %435 = vmatmul.bf16.vlgmr.msrb.gmra.mxu3 %v375_v48 }
  0xdc   :  { %660 = vmatpush.bf16.msrb.mxu0 %v1783_v3  ;;  %673 = vmatpush.bf16.msrb.mxu1 %v1785_v7 }
  0xdd   :  { %686 = vmatpush.bf16.msrb.mxu2 %v1798_v21  ;;  %699 = vmatpush.bf16.msrb.mxu3 %v1787_v8 }
  0xe0   :  { %661 = vmatpush.bf16.msrb.mxu0 %v1790_v12  ;;  %674 = vmatpush.bf16.msrb.mxu1 %v1794_v16 }
  0xe1   :  { %687 = vmatpush.bf16.msrb.mxu2 %v1810_v34  ;;  %700 = vmatpush.bf16.msrb.mxu3 %v1796_v17 }
  0xe4   :  { %662 = vmatpush.bf16.msrb.mxu0 %v1802_v28  ;;  %675 = vmatpush.bf16.msrb.mxu1 %v1806_v32 }
  0xe5   :  { %688 = vmatpush.bf16.msrb.mxu2 %v1816_v42  ;;  %701 = vmatpush.bf16.msrb.mxu3 %v1808_v33 }
  0xe8   :  { %663 = vmatpush.bf16.msrb.mxu0 %v1814_v41  ;;  %676 = vmatpush.bf16.msrb.mxu1 %v1820_v45 }
  0xe9   :  { %689 = vmatpush.bf16.msrb.mxu2 %v1828_v54  ;;  %702 = vmatpush.bf16.msrb.mxu3 %v1822_v46 }
  0xec   :  { %664 = vmatpush.bf16.msrb.mxu0 %v1826_v53  ;;  %677 = vmatpush.bf16.msrb.mxu1 %v1832_v57 }
  0xed   :  { %690 = vmatpush.bf16.msrb.mxu2 %v1840_v2  ;;  %703 = vmatpush.bf16.msrb.mxu3 %v1834_v58 }
  0xf0   :  { %665 = vmatpush.bf16.msrb.mxu0 %v1838_v1  ;;  %678 = vmatpush.bf16.msrb.mxu1 %v1844_v6 }
  0xf1   :  { %691 = vmatpush.bf16.msrb.mxu2 %v1852_v20  ;;  %704 = vmatpush.bf16.msrb.mxu3 %v1846_v9 }
  0xf4   :  { %666 = vmatpush.bf16.msrb.mxu0 %v1850_v19  ;;  %679 = vmatpush.bf16.msrb.mxu1 %v1856_v24 }
  0xf5   :  { %692 = vmatpush.bf16.msrb.mxu2 %v1864_v37  ;;  %705 = vmatpush.bf16.msrb.mxu3 %v1858_v25 }
  0xf8   :  { %667 = vmatpush.bf16.msrb.mxu0 %v1862_v36  ;;  %680 = vmatpush.bf16.msrb.mxu1 %v1868_v38 }
  0xf9   :  { %693 = vmatpush.bf16.msrb.mxu2 %v1876_v44  ;;  %706 = vmatpush.bf16.msrb.mxu3 %v1870_v39 }
 0x157   :  { %v397_v51 = vpop.f32.mrf.mxu0  ;;  %v410_v52 = vpop.f32.mrf.mxu1 }
 0x158   :  { %v440_v55 = vadd.f32 %v397_v51, %v382_v49  ;;  %v441_v56 = vadd.f32 %v410_v52, %v383_v50 }
 0x15a   :  { %v1487_v60 = vmul.f32 -1.442695, %v440_v55  ;;  %v1488_v61 = vmul.f32 -1.442695, %v441_v56 }
 0x15c   :  { %1564 = vpow2.f32 %v1487_v60 }
 0x15d   :  { %1566 = vpow2.f32 %v1488_v61 }
 0x15e   :  { %v423_v63 = vpop.f32.mrf.mxu2  ;;  %v436_v0 = vpop.f32.mrf.mxu3 }
 0x15f   :  { %v443_v4 = vadd.f32 %v436_v0, %v385_v62  ;;  %v399_v5 = vpop.f32.mrf.mxu0  ;;  %v412_v10 = vpop.f32.mrf.mxu1  ;;  %v442_v43 = vadd.f32 %v423_v63, %v384_v18 }
 0x161   :  { %v1489_v11 = vmul.f32 -1.442695, %v443_v4 }
 0x162   :  { %v1565_v13 = vpop.eup %1564 }
 0x163   :  { %v1567_v14 = vpop.eup %1566  ;;  %v447_v22 = vadd.f32 1.0, %v1565_v13  ;;  %1568 = vpow2.f32 %v1489_v11 }
 0x164   :  { %v466_v23 = vadd.f32 1.0, %v1567_v14 }
 0x165   :  { %1570 = vrcp.f32 %v447_v22  ;;  %v459_v50 = vand.u32 2147483648, %v447_v22  ;;  %v457_v55 = vand.u32 2147483647, %v447_v22  ;;  %vm453_vm14 = vweird.f32 %v447_v22 }
 0x166   :  { %1572 = vrcp.f32 %v466_v23  ;;  %v425_v26 = vpop.f32.mrf.mxu2  ;;  %v438_v15 = vpop.f32.mrf.mxu3  ;;  %v478_v51 = vand.u32 2147483648, %v466_v23  ;;  %v476_v60 = vand.u32 2147483647, %v466_v23  ;;  %vm472_vm15 = vweird.f32 %v466_v23 }
 0x167   :  { %v460_v62 = vor.u32 1.1754944e-38, %v459_v50  ;;  %vm458_vm2 = vcmp.eq.f32.partialorder %v457_v55, 8.507059e+37 }
 0x168   :  { %v479_v4 = vor.u32 1.1754944e-38, %v478_v51  ;;  %vm477_vm3 = vcmp.eq.f32.partialorder %v476_v60, 8.507059e+37 }
 0x169   :  { %v1569_v30 = vpop.eup %1568 }
 0x16a   :  { %v486_v31 = vadd.f32 1.0, %v1569_v30 }
 0x16b   :  { %v1571_v40 = vpop.eup %1570 }
 0x16c   :  { %v1573_v35 = vpop.eup %1572  ;;  %v449_v47 = vmul.f32 %v1571_v40, %v447_v22  ;;  %1574 = vrcp.f32 %v486_v31  ;;  %vm454_vm12 = vweird.f32 %v1571_v40  ;;  %vm492_vm5 = vweird.f32 %v486_v31 }
 0x16d   :  { %v468_v48 = vmul.f32 %v1573_v35, %v466_v23  ;;  %1576 = vtanh.f32 %v442_v43  ;;  %vm473_vm13 = vweird.f32 %v1573_v35  ;;  %vm455_vm0 = vmor %vm453_vm14, %vm454_vm12  ;;  %v498_v43 = vand.u32 2147483648, %v486_v31 }
 0x16e   :  { %v450_v29 = vsub.f32 1.0, %v449_v47  ;;  %vm474_vm1 = vmor %vm472_vm15, %vm473_vm13 }
 0x16f   :  { %v469_v49 = vsub.f32 1.0, %v468_v48  ;;  %v499_v48 = vor.u32 1.1754944e-38, %v498_v43 }
 0x170   :  { %v451_v52 = vmul.f32 %v1571_v40, %v450_v29 }
 0x171   :  { %v470_v56 = vmul.f32 %v1573_v35, %v469_v49 }
 0x172   :  { %v1575_v59 = vpop.eup %1574  ;;  %v452_v61 = vadd.f32 %v1571_v40, %v451_v52 }
 0x173   :  { %v471_v63 = vadd.f32 %v1573_v35, %v470_v56  ;;  %v488_v0 = vmul.f32 %v1575_v59, %v486_v31  ;;  %v1577_v10 = vpop.eup %1576  ;;  %vm493_vm4 = vweird.f32 %v1575_v59 }
 0x174   :  { %v456_v5 = vsel %vm455_vm0, %v1571_v40, %v452_v61  ;;  %v496_v40 = vand.u32 2147483647, %v486_v31  ;;  %vm494_vm6 = vmor %vm492_vm5, %vm493_vm4 }
 0x175   :  { %v461_v11 = vsel %vm458_vm2, %v460_v62, %v456_v5  ;;  %v475_v13 = vsel %vm474_vm1, %v1573_v35, %v471_v63  ;;  %v489_v14 = vsub.f32 1.0, %v488_v0 }
 0x176   :  { %v480_v26 = vsel %vm477_vm3, %v479_v4, %v475_v13  ;;  %v504_v15 = vmul.f32 %v1577_v10, %v461_v11  ;;  %vm497_vm7 = vcmp.eq.f32.partialorder %v496_v40, 8.507059e+37 }
 0x177   :  { %v503_v18 = vmul.f32 %v480_v26, %v1943_v27  ;;  %v490_v30 = vmul.f32 %v1575_v59, %v489_v14  ;;  %v516_v27 = vld [vmem:[#allocation4 + $0x20] sm:$0xff] }
 0x178   :  { %v518_v31 = vunpack.c.l.bf16 %v516_v27  ;;  %v519_v51 = vunpack.c.h.bf16 %v516_v27 }
 0x179   :  { %v1979_v22 = vadd.f32 %v504_v15, %v503_v18  ;;  %v491_v23 = vadd.f32 %v1575_v59, %v490_v30 }
 0x17b   :  { %1578 = vtanh.f32 %v1979_v22  ;;  %v495_v47 = vsel %vm494_vm6, %v1575_v59, %v491_v23  ;;  %v517_v59 = vld [vmem:[#allocation4 + $0x28] sm:$0xff] }
 0x17c   :  { %v500_v29 = vsel %vm497_vm7, %v499_v48, %v495_v47  ;;  %v521_v63 = vunpack.c.h.bf16 %v517_v59  ;;  %v520_v43 = vunpack.c.l.bf16 %v517_v59 }
 0x181   :  { %v1579_v35 = vpop.eup %1578 }
 0x182   :  { %v507_v49 = vmul.f32 %v1579_v35, %v500_v29 }
 0x184   :  { %v510_v50 = vpack.c.bf16 %v507_v49, %v507_v49 }
 0x186   :  { %512 = vst [vmem:[#allocation9 + $0x4] sm:$0xf] %v510_v50  ;;  %532 = vmatmul.bf16.vlgmr.msra.gmra.mxu0 %v510_v50  ;;  %545 = vmatmul.bf16.vlgmr.msra.gmra.mxu1 %v510_v50 }
 0x187   :  { %558 = vmatmul.bf16.vlgmr.msra.gmra.mxu2 %v510_v50  ;;  %571 = vmatmul.bf16.vlgmr.msra.gmra.mxu3 %v510_v50 }
 0x188   :  { %796 = vmatpush.bf16.msra.mxu0 %v1783_v3  ;;  %809 = vmatpush.bf16.msra.mxu1 %v1785_v7 }
 0x189   :  { %822 = vmatpush.bf16.msra.mxu2 %v1798_v21  ;;  %835 = vmatpush.bf16.msra.mxu3 %v1787_v8 }
 0x18c   :  { %797 = vmatpush.bf16.msra.mxu0 %v1790_v12  ;;  %810 = vmatpush.bf16.msra.mxu1 %v1794_v16 }
 0x18d   :  { %823 = vmatpush.bf16.msra.mxu2 %v1810_v34  ;;  %836 = vmatpush.bf16.msra.mxu3 %v1796_v17 }
 0x190   :  { %798 = vmatpush.bf16.msra.mxu0 %v1802_v28  ;;  %811 = vmatpush.bf16.msra.mxu1 %v1806_v32 }
 0x191   :  { %824 = vmatpush.bf16.msra.mxu2 %v1816_v42  ;;  %837 = vmatpush.bf16.msra.mxu3 %v1808_v33 }
 0x194   :  { %799 = vmatpush.bf16.msra.mxu0 %v1814_v41  ;;  %812 = vmatpush.bf16.msra.mxu1 %v1820_v45 }
 0x195   :  { %825 = vmatpush.bf16.msra.mxu2 %v1828_v54  ;;  %838 = vmatpush.bf16.msra.mxu3 %v1822_v46 }
 0x198   :  { %800 = vmatpush.bf16.msra.mxu0 %v1826_v53  ;;  %813 = vmatpush.bf16.msra.mxu1 %v1832_v57 }
 0x199   :  { %826 = vmatpush.bf16.msra.mxu2 %v1840_v2  ;;  %839 = vmatpush.bf16.msra.mxu3 %v1834_v58 }
 0x19c   :  { %801 = vmatpush.bf16.msra.mxu0 %v1838_v1  ;;  %814 = vmatpush.bf16.msra.mxu1 %v1844_v6 }
 0x19d   :  { %827 = vmatpush.bf16.msra.mxu2 %v1852_v20  ;;  %840 = vmatpush.bf16.msra.mxu3 %v1846_v9 }
 0x1a0   :  { %802 = vmatpush.bf16.msra.mxu0 %v1850_v19  ;;  %815 = vmatpush.bf16.msra.mxu1 %v1856_v24 }
 0x1a1   :  { %828 = vmatpush.bf16.msra.mxu2 %v1864_v37  ;;  %841 = vmatpush.bf16.msra.mxu3 %v1858_v25 }
 0x1a4   :  { %803 = vmatpush.bf16.msra.mxu0 %v1862_v36  ;;  %816 = vmatpush.bf16.msra.mxu1 %v1868_v38 }
 0x1a5   :  { %829 = vmatpush.bf16.msra.mxu2 %v1876_v44  ;;  %842 = vmatpush.bf16.msra.mxu3 %v1870_v39 }
 0x203   :  { %v533_v52 = vpop.f32.mrf.mxu0  ;;  %v546_v55 = vpop.f32.mrf.mxu1 }
 0x204   :  { %v576_v56 = vadd.f32 %v533_v52, %v518_v31  ;;  %v577_v60 = vadd.f32 %v546_v55, %v519_v51 }
 0x206   :  { %v1490_v61 = vmul.f32 -1.442695, %v576_v56  ;;  %v1491_v62 = vmul.f32 -1.442695, %v577_v60 }
 0x208   :  { %1580 = vpow2.f32 %v1490_v61 }
 0x209   :  { %1582 = vpow2.f32 %v1491_v62 }
 0x20a   :  { %v559_v0 = vpop.f32.mrf.mxu2  ;;  %v572_v4 = vpop.f32.mrf.mxu3 }
 0x20b   :  { %v579_v5 = vadd.f32 %v572_v4, %v521_v63  ;;  %v535_v10 = vpop.f32.mrf.mxu0  ;;  %v548_v11 = vpop.f32.mrf.mxu1  ;;  %v578_v35 = vadd.f32 %v559_v0, %v520_v43 }
 0x20d   :  { %v1492_v13 = vmul.f32 -1.442695, %v579_v5 }
 0x20e   :  { %v1581_v14 = vpop.eup %1580 }
 0x20f   :  { %v1583_v26 = vpop.eup %1582  ;;  %v583_v15 = vadd.f32 1.0, %v1581_v14  ;;  %1584 = vpow2.f32 %v1492_v13 }
 0x210   :  { %v602_v18 = vadd.f32 1.0, %v1583_v26 }
 0x211   :  { %1586 = vrcp.f32 %v583_v15  ;;  %v595_v51 = vand.u32 2147483648, %v583_v15  ;;  %v593_v56 = vand.u32 2147483647, %v583_v15  ;;  %vm589_vm10 = vweird.f32 %v583_v15 }
 0x212   :  { %1588 = vrcp.f32 %v602_v18  ;;  %v561_v30 = vpop.f32.mrf.mxu2  ;;  %v574_v23 = vpop.f32.mrf.mxu3  ;;  %v614_v52 = vand.u32 2147483648, %v602_v18  ;;  %v612_v61 = vand.u32 2147483647, %v602_v18  ;;  %vm608_vm11 = vweird.f32 %v602_v18 }
 0x213   :  { %v596_v63 = vor.u32 1.1754944e-38, %v595_v51  ;;  %vm594_vm14 = vcmp.eq.f32.partialorder %v593_v56, 8.507059e+37 }
 0x214   :  { %v615_v5 = vor.u32 1.1754944e-38, %v614_v52  ;;  %vm613_vm15 = vcmp.eq.f32.partialorder %v612_v61, 8.507059e+37 }
 0x215   :  { %v1585_v40 = vpop.eup %1584 }
 0x216   :  { %v622_v47 = vadd.f32 1.0, %v1585_v40 }
 0x217   :  { %v1587_v48 = vpop.eup %1586 }
 0x218   :  { %v1589_v29 = vpop.eup %1588  ;;  %v585_v49 = vmul.f32 %v1587_v48, %v583_v15  ;;  %1590 = vrcp.f32 %v622_v47  ;;  %vm590_vm8 = vweird.f32 %v1587_v48  ;;  %vm628_vm1 = vweird.f32 %v622_v47 }
 0x219   :  { %v604_v50 = vmul.f32 %v1589_v29, %v602_v18  ;;  %1592 = vtanh.f32 %v578_v35  ;;  %vm609_vm9 = vweird.f32 %v1589_v29  ;;  %vm591_vm12 = vmor %vm589_vm10, %vm590_vm8  ;;  %v634_v35 = vand.u32 2147483648, %v622_v47 }
 0x21a   :  { %v586_v27 = vsub.f32 1.0, %v585_v49  ;;  %vm610_vm13 = vmor %vm608_vm11, %vm609_vm9 }
 0x21b   :  { %v605_v31 = vsub.f32 1.0, %v604_v50  ;;  %v635_v50 = vor.u32 1.1754944e-38, %v634_v35 }
 0x21c   :  { %v587_v55 = vmul.f32 %v1587_v48, %v586_v27 }
 0x21d   :  { %v606_v60 = vmul.f32 %v1589_v29, %v605_v31 }
 0x21e   :  { %v1591_v59 = vpop.eup %1590  ;;  %v588_v62 = vadd.f32 %v1587_v48, %v587_v55 }
 0x21f   :  { %v607_v0 = vadd.f32 %v1589_v29, %v606_v60  ;;  %v624_v4 = vmul.f32 %v1591_v59, %v622_v47  ;;  %v1593_v11 = vpop.eup %1592  ;;  %vm629_vm0 = vweird.f32 %v1591_v59 }
 0x220   :  { %v592_v10 = vsel %vm591_vm12, %v1587_v48, %v588_v62  ;;  %v632_v48 = vand.u32 2147483647, %v622_v47  ;;  %vm630_vm2 = vmor %vm628_vm1, %vm629_vm0 }
 0x221   :  { %v597_v13 = vsel %vm594_vm14, %v596_v63, %v592_v10  ;;  %v611_v14 = vsel %vm610_vm13, %v1589_v29, %v607_v0  ;;  %v625_v26 = vsub.f32 1.0, %v624_v4 }
 0x222   :  { %v616_v30 = vsel %vm613_vm15, %v615_v5, %v611_v14  ;;  %v640_v23 = vmul.f32 %v1593_v11, %v597_v13  ;;  %vm633_vm3 = vcmp.eq.f32.partialorder %v632_v48, 8.507059e+37 }
 0x223   :  { %v639_v43 = vmul.f32 %v616_v30, %v1979_v22  ;;  %v626_v40 = vmul.f32 %v1591_v59, %v625_v26  ;;  %v652_v22 = vld [vmem:[#allocation4 + $0x30] sm:$0xff] }
 0x224   :  { %v654_v47 = vunpack.c.l.bf16 %v652_v22  ;;  %v655_v52 = vunpack.c.h.bf16 %v652_v22 }
 0x225   :  { %v2015_v15 = vadd.f32 %v640_v23, %v639_v43  ;;  %v627_v18 = vadd.f32 %v1591_v59, %v626_v40 }
 0x227   :  { %1594 = vtanh.f32 %v2015_v15  ;;  %v631_v49 = vsel %vm630_vm2, %v1591_v59, %v627_v18  ;;  %v653_v59 = vld [vmem:[#allocation4 + $0x38] sm:$0xff] }
 0x228   :  { %v636_v27 = vsel %vm633_vm3, %v635_v50, %v631_v49  ;;  %v657_v0 = vunpack.c.h.bf16 %v653_v59  ;;  %v656_v35 = vunpack.c.l.bf16 %v653_v59 }
 0x22d   :  { %v1595_v29 = vpop.eup %1594 }
 0x22e   :  { %v643_v31 = vmul.f32 %v1595_v29, %v636_v27 }
 0x230   :  { %v646_v51 = vpack.c.bf16 %v643_v31, %v643_v31 }
 0x232   :  { %648 = vst [vmem:[#allocation9 + $0x8] sm:$0xf] %v646_v51  ;;  %668 = vmatmul.bf16.vlgmr.msrb.gmra.mxu0 %v646_v51  ;;  %681 = vmatmul.bf16.vlgmr.msrb.gmra.mxu1 %v646_v51 }
 0x233   :  { %694 = vmatmul.bf16.vlgmr.msrb.gmra.mxu2 %v646_v51  ;;  %707 = vmatmul.bf16.vlgmr.msrb.gmra.mxu3 %v646_v51 }
 0x234   :  { %932 = vmatpush.bf16.msrb.mxu0 %v1783_v3  ;;  %945 = vmatpush.bf16.msrb.mxu1 %v1785_v7 }
 0x235   :  { %958 = vmatpush.bf16.msrb.mxu2 %v1798_v21  ;;  %971 = vmatpush.bf16.msrb.mxu3 %v1787_v8 }
 0x238   :  { %933 = vmatpush.bf16.msrb.mxu0 %v1790_v12  ;;  %946 = vmatpush.bf16.msrb.mxu1 %v1794_v16 }
 0x239   :  { %959 = vmatpush.bf16.msrb.mxu2 %v1810_v34  ;;  %972 = vmatpush.bf16.msrb.mxu3 %v1796_v17 }
 0x23c   :  { %934 = vmatpush.bf16.msrb.mxu0 %v1802_v28  ;;  %947 = vmatpush.bf16.msrb.mxu1 %v1806_v32 }
 0x23d   :  { %960 = vmatpush.bf16.msrb.mxu2 %v1816_v42  ;;  %973 = vmatpush.bf16.msrb.mxu3 %v1808_v33 }
 0x240   :  { %935 = vmatpush.bf16.msrb.mxu0 %v1814_v41  ;;  %948 = vmatpush.bf16.msrb.mxu1 %v1820_v45 }
 0x241   :  { %961 = vmatpush.bf16.msrb.mxu2 %v1828_v54  ;;  %974 = vmatpush.bf16.msrb.mxu3 %v1822_v46 }
 0x244   :  { %936 = vmatpush.bf16.msrb.mxu0 %v1826_v53  ;;  %949 = vmatpush.bf16.msrb.mxu1 %v1832_v57 }
 0x245   :  { %962 = vmatpush.bf16.msrb.mxu2 %v1840_v2  ;;  %975 = vmatpush.bf16.msrb.mxu3 %v1834_v58 }
 0x248   :  { %937 = vmatpush.bf16.msrb.mxu0 %v1838_v1  ;;  %950 = vmatpush.bf16.msrb.mxu1 %v1844_v6 }
 0x249   :  { %963 = vmatpush.bf16.msrb.mxu2 %v1852_v20  ;;  %976 = vmatpush.bf16.msrb.mxu3 %v1846_v9 }
 0x24c   :  { %938 = vmatpush.bf16.msrb.mxu0 %v1850_v19  ;;  %951 = vmatpush.bf16.msrb.mxu1 %v1856_v24 }
 0x24d   :  { %964 = vmatpush.bf16.msrb.mxu2 %v1864_v37  ;;  %977 = vmatpush.bf16.msrb.mxu3 %v1858_v25 }
 0x250   :  { %939 = vmatpush.bf16.msrb.mxu0 %v1862_v36  ;;  %952 = vmatpush.bf16.msrb.mxu1 %v1868_v38 }
 0x251   :  { %965 = vmatpush.bf16.msrb.mxu2 %v1876_v44  ;;  %978 = vmatpush.bf16.msrb.mxu3 %v1870_v39 }
 0x2af   :  { %v669_v55 = vpop.f32.mrf.mxu0  ;;  %v682_v56 = vpop.f32.mrf.mxu1 }
 0x2b0   :  { %v712_v60 = vadd.f32 %v669_v55, %v654_v47  ;;  %v713_v61 = vadd.f32 %v682_v56, %v655_v52 }
 0x2b2   :  { %v1493_v62 = vmul.f32 -1.442695, %v712_v60  ;;  %v1494_v63 = vmul.f32 -1.442695, %v713_v61 }
 0x2b4   :  { %1596 = vpow2.f32 %v1493_v62 }
 0x2b5   :  { %1598 = vpow2.f32 %v1494_v63 }
 0x2b6   :  { %v695_v4 = vpop.f32.mrf.mxu2  ;;  %v708_v5 = vpop.f32.mrf.mxu3 }
 0x2b7   :  { %v715_v10 = vadd.f32 %v708_v5, %v657_v0  ;;  %v671_v11 = vpop.f32.mrf.mxu0  ;;  %v684_v13 = vpop.f32.mrf.mxu1  ;;  %v714_v29 = vadd.f32 %v695_v4, %v656_v35 }
 0x2b9   :  { %v1495_v14 = vmul.f32 -1.442695, %v715_v10 }
 0x2ba   :  { %v1597_v26 = vpop.eup %1596 }
 0x2bb   :  { %v1599_v30 = vpop.eup %1598  ;;  %v719_v23 = vadd.f32 1.0, %v1597_v26  ;;  %1600 = vpow2.f32 %v1495_v14 }
 0x2bc   :  { %v738_v43 = vadd.f32 1.0, %v1599_v30 }
 0x2bd   :  { %1602 = vrcp.f32 %v719_v23  ;;  %v731_v52 = vand.u32 2147483648, %v719_v23  ;;  %v729_v60 = vand.u32 2147483647, %v719_v23  ;;  %vm725_vm6 = vweird.f32 %v719_v23 }
 0x2be   :  { %1604 = vrcp.f32 %v738_v43  ;;  %v697_v40 = vpop.f32.mrf.mxu2  ;;  %v710_v18 = vpop.f32.mrf.mxu3  ;;  %v750_v55 = vand.u32 2147483648, %v738_v43  ;;  %v748_v62 = vand.u32 2147483647, %v738_v43  ;;  %vm744_vm7 = vweird.f32 %v738_v43 }
 0x2bf   :  { %v732_v0 = vor.u32 1.1754944e-38, %v731_v52  ;;  %vm730_vm10 = vcmp.eq.f32.partialorder %v729_v60, 8.507059e+37 }
 0x2c0   :  { %v751_v10 = vor.u32 1.1754944e-38, %v750_v55  ;;  %vm749_vm11 = vcmp.eq.f32.partialorder %v748_v62, 8.507059e+37 }
 0x2c1   :  { %v1601_v48 = vpop.eup %1600 }
 0x2c2   :  { %v758_v49 = vadd.f32 1.0, %v1601_v48 }
 0x2c3   :  { %v1603_v50 = vpop.eup %1602 }
 0x2c4   :  { %v1605_v27 = vpop.eup %1604  ;;  %v721_v31 = vmul.f32 %v1603_v50, %v719_v23  ;;  %1606 = vrcp.f32 %v758_v49  ;;  %vm726_vm4 = vweird.f32 %v1603_v50  ;;  %vm764_vm13 = vweird.f32 %v758_v49 }
 0x2c5   :  { %v740_v51 = vmul.f32 %v1605_v27, %v738_v43  ;;  %1608 = vtanh.f32 %v714_v29  ;;  %vm745_vm5 = vweird.f32 %v1605_v27  ;;  %vm727_vm8 = vmor %vm725_vm6, %vm726_vm4  ;;  %v770_v29 = vand.u32 2147483648, %v758_v49 }
 0x2c6   :  { %v722_v22 = vsub.f32 1.0, %v721_v31  ;;  %vm746_vm9 = vmor %vm744_vm7, %vm745_vm5 }
 0x2c7   :  { %v741_v47 = vsub.f32 1.0, %v740_v51  ;;  %v771_v51 = vor.u32 1.1754944e-38, %v770_v29 }
 0x2c8   :  { %v723_v56 = vmul.f32 %v1603_v50, %v722_v22 }
 0x2c9   :  { %v742_v61 = vmul.f32 %v1605_v27, %v741_v47 }
 0x2ca   :  { %v1607_v59 = vpop.eup %1606  ;;  %v724_v63 = vadd.f32 %v1603_v50, %v723_v56 }
 0x2cb   :  { %v743_v4 = vadd.f32 %v1605_v27, %v742_v61  ;;  %v760_v5 = vmul.f32 %v1607_v59, %v758_v49  ;;  %v1609_v13 = vpop.eup %1608  ;;  %vm765_vm12 = vweird.f32 %v1607_v59 }
 0x2cc   :  { %v728_v11 = vsel %vm727_vm8, %v1603_v50, %v724_v63  ;;  %v768_v50 = vand.u32 2147483647, %v758_v49  ;;  %vm766_vm14 = vmor %vm764_vm13, %vm765_vm12 }
 0x2cd   :  { %v733_v14 = vsel %vm730_vm10, %v732_v0, %v728_v11  ;;  %v747_v26 = vsel %vm746_vm9, %v1605_v27, %v743_v4  ;;  %v761_v30 = vsub.f32 1.0, %v760_v5 }
 0x2ce   :  { %v752_v40 = vsel %vm749_vm11, %v751_v10, %v747_v26  ;;  %v776_v18 = vmul.f32 %v1609_v13, %v733_v14  ;;  %vm769_vm15 = vcmp.eq.f32.partialorder %v768_v50, 8.507059e+37 }
 0x2cf   :  { %v775_v35 = vmul.f32 %v752_v40, %v2015_v15  ;;  %v762_v48 = vmul.f32 %v1607_v59, %v761_v30  ;;  %v788_v15 = vld [vmem:[#allocation4 + $0x40] sm:$0xff] }
 0x2d0   :  { %v790_v49 = vunpack.c.l.bf16 %v788_v15  ;;  %v791_v55 = vunpack.c.h.bf16 %v788_v15 }
 0x2d1   :  { %v2051_v23 = vadd.f32 %v776_v18, %v775_v35  ;;  %v763_v43 = vadd.f32 %v1607_v59, %v762_v48 }
 0x2d3   :  { %1610 = vtanh.f32 %v2051_v23  ;;  %v767_v31 = vsel %vm766_vm14, %v1607_v59, %v763_v43  ;;  %v789_v59 = vld [vmem:[#allocation4 + $0x48] sm:$0xff] }
 0x2d4   :  { %v772_v22 = vsel %vm769_vm15, %v771_v51, %v767_v31  ;;  %v793_v4 = vunpack.c.h.bf16 %v789_v59  ;;  %v792_v29 = vunpack.c.l.bf16 %v789_v59 }
 0x2d9   :  { %v1611_v27 = vpop.eup %1610 }
 0x2da   :  { %v779_v47 = vmul.f32 %v1611_v27, %v772_v22 }
 0x2dc   :  { %v782_v52 = vpack.c.bf16 %v779_v47, %v779_v47 }
 0x2de   :  { %784 = vst [vmem:[#allocation9 + $0xc] sm:$0xf] %v782_v52  ;;  %804 = vmatmul.bf16.vlgmr.msra.gmra.mxu0 %v782_v52  ;;  %817 = vmatmul.bf16.vlgmr.msra.gmra.mxu1 %v782_v52 }
 0x2df   :  { %830 = vmatmul.bf16.vlgmr.msra.gmra.mxu2 %v782_v52  ;;  %843 = vmatmul.bf16.vlgmr.msra.gmra.mxu3 %v782_v52 }
 0x2e0   :  { %1068 = vmatpush.bf16.msra.mxu0 %v1783_v3  ;;  %1081 = vmatpush.bf16.msra.mxu1 %v1785_v7 }
 0x2e1   :  { %1094 = vmatpush.bf16.msra.mxu2 %v1798_v21  ;;  %1107 = vmatpush.bf16.msra.mxu3 %v1787_v8 }
 0x2e4   :  { %1069 = vmatpush.bf16.msra.mxu0 %v1790_v12  ;;  %1082 = vmatpush.bf16.msra.mxu1 %v1794_v16 }
 0x2e5   :  { %1095 = vmatpush.bf16.msra.mxu2 %v1810_v34  ;;  %1108 = vmatpush.bf16.msra.mxu3 %v1796_v17 }
 0x2e8   :  { %1070 = vmatpush.bf16.msra.mxu0 %v1802_v28  ;;  %1083 = vmatpush.bf16.msra.mxu1 %v1806_v32 }
 0x2e9   :  { %1096 = vmatpush.bf16.msra.mxu2 %v1816_v42  ;;  %1109 = vmatpush.bf16.msra.mxu3 %v1808_v33 }
 0x2ec   :  { %1071 = vmatpush.bf16.msra.mxu0 %v1814_v41  ;;  %1084 = vmatpush.bf16.msra.mxu1 %v1820_v45 }
 0x2ed   :  { %1097 = vmatpush.bf16.msra.mxu2 %v1828_v54  ;;  %1110 = vmatpush.bf16.msra.mxu3 %v1822_v46 }
 0x2f0   :  { %1072 = vmatpush.bf16.msra.mxu0 %v1826_v53  ;;  %1085 = vmatpush.bf16.msra.mxu1 %v1832_v57 }
 0x2f1   :  { %1098 = vmatpush.bf16.msra.mxu2 %v1840_v2  ;;  %1111 = vmatpush.bf16.msra.mxu3 %v1834_v58 }
 0x2f4   :  { %1073 = vmatpush.bf16.msra.mxu0 %v1838_v1  ;;  %1086 = vmatpush.bf16.msra.mxu1 %v1844_v6 }
 0x2f5   :  { %1099 = vmatpush.bf16.msra.mxu2 %v1852_v20  ;;  %1112 = vmatpush.bf16.msra.mxu3 %v1846_v9 }
 0x2f8   :  { %1074 = vmatpush.bf16.msra.mxu0 %v1850_v19  ;;  %1087 = vmatpush.bf16.msra.mxu1 %v1856_v24 }
 0x2f9   :  { %1100 = vmatpush.bf16.msra.mxu2 %v1864_v37  ;;  %1113 = vmatpush.bf16.msra.mxu3 %v1858_v25 }
 0x2fc   :  { %1075 = vmatpush.bf16.msra.mxu0 %v1862_v36  ;;  %1088 = vmatpush.bf16.msra.mxu1 %v1868_v38 }
 0x2fd   :  { %1101 = vmatpush.bf16.msra.mxu2 %v1876_v44  ;;  %1114 = vmatpush.bf16.msra.mxu3 %v1870_v39 }
 0x35b   :  { %v805_v56 = vpop.f32.mrf.mxu0  ;;  %v818_v60 = vpop.f32.mrf.mxu1 }
 0x35c   :  { %v848_v61 = vadd.f32 %v805_v56, %v790_v49  ;;  %v849_v62 = vadd.f32 %v818_v60, %v791_v55 }
 0x35e   :  { %v1496_v63 = vmul.f32 -1.442695, %v848_v61  ;;  %v1497_v0 = vmul.f32 -1.442695, %v849_v62 }
 0x360   :  { %1612 = vpow2.f32 %v1496_v63 }
 0x361   :  { %1614 = vpow2.f32 %v1497_v0 }
 0x362   :  { %v831_v5 = vpop.f32.mrf.mxu2  ;;  %v844_v10 = vpop.f32.mrf.mxu3 }
 0x363   :  { %v851_v11 = vadd.f32 %v844_v10, %v793_v4  ;;  %v807_v13 = vpop.f32.mrf.mxu0  ;;  %v820_v14 = vpop.f32.mrf.mxu1  ;;  %v850_v27 = vadd.f32 %v831_v5, %v792_v29 }
 0x365   :  { %v1498_v26 = vmul.f32 -1.442695, %v851_v11 }
 0x366   :  { %v1613_v30 = vpop.eup %1612 }
 0x367   :  { %v1615_v40 = vpop.eup %1614  ;;  %v855_v18 = vadd.f32 1.0, %v1613_v30  ;;  %1616 = vpow2.f32 %v1498_v26 }
 0x368   :  { %v874_v35 = vadd.f32 1.0, %v1615_v40 }
 0x369   :  { %1618 = vrcp.f32 %v855_v18  ;;  %v867_v55 = vand.u32 2147483648, %v855_v18  ;;  %v865_v61 = vand.u32 2147483647, %v855_v18  ;;  %vm861_vm2 = vweird.f32 %v855_v18 }
 0x36a   :  { %1620 = vrcp.f32 %v874_v35  ;;  %v833_v48 = vpop.f32.mrf.mxu2  ;;  %v846_v43 = vpop.f32.mrf.mxu3  ;;  %v886_v56 = vand.u32 2147483648, %v874_v35  ;;  %v884_v63 = vand.u32 2147483647, %v874_v35  ;;  %vm880_vm3 = vweird.f32 %v874_v35 }
 0x36b   :  { %v868_v4 = vor.u32 1.1754944e-38, %v867_v55  ;;  %vm866_vm6 = vcmp.eq.f32.partialorder %v865_v61, 8.507059e+37 }
 0x36c   :  { %v887_v11 = vor.u32 1.1754944e-38, %v886_v56  ;;  %vm885_vm7 = vcmp.eq.f32.partialorder %v884_v63, 8.507059e+37 }
 0x36d   :  { %v1617_v50 = vpop.eup %1616 }
 0x36e   :  { %v894_v31 = vadd.f32 1.0, %v1617_v50 }
 0x36f   :  { %v1619_v51 = vpop.eup %1618 }
 0x370   :  { %v1621_v22 = vpop.eup %1620  ;;  %v857_v47 = vmul.f32 %v1619_v51, %v855_v18  ;;  %1622 = vrcp.f32 %v894_v31  ;;  %vm862_vm0 = vweird.f32 %v1619_v51  ;;  %vm900_vm9 = vweird.f32 %v894_v31 }
 0x371   :  { %v876_v52 = vmul.f32 %v1621_v22, %v874_v35  ;;  %1624 = vtanh.f32 %v850_v27  ;;  %vm881_vm1 = vweird.f32 %v1621_v22  ;;  %vm863_vm4 = vmor %vm861_vm2, %vm862_vm0  ;;  %v906_v27 = vand.u32 2147483648, %v894_v31 }
 0x372   :  { %v858_v15 = vsub.f32 1.0, %v857_v47  ;;  %vm882_vm5 = vmor %vm880_vm3, %vm881_vm1 }
 0x373   :  { %v877_v49 = vsub.f32 1.0, %v876_v52  ;;  %v907_v52 = vor.u32 1.1754944e-38, %v906_v27 }
 0x374   :  { %v859_v60 = vmul.f32 %v1619_v51, %v858_v15 }
 0x375   :  { %v878_v62 = vmul.f32 %v1621_v22, %v877_v49 }
 0x376   :  { %v1623_v59 = vpop.eup %1622  ;;  %v860_v0 = vadd.f32 %v1619_v51, %v859_v60 }
 0x377   :  { %v879_v5 = vadd.f32 %v1621_v22, %v878_v62  ;;  %v896_v10 = vmul.f32 %v1623_v59, %v894_v31  ;;  %v1625_v14 = vpop.eup %1624  ;;  %vm901_vm8 = vweird.f32 %v1623_v59 }
 0x378   :  { %v864_v13 = vsel %vm863_vm4, %v1619_v51, %v860_v0  ;;  %v904_v51 = vand.u32 2147483647, %v894_v31  ;;  %vm902_vm10 = vmor %vm900_vm9, %vm901_vm8 }
 0x379   :  { %v869_v26 = vsel %vm866_vm6, %v868_v4, %v864_v13  ;;  %v883_v30 = vsel %vm882_vm5, %v1621_v22, %v879_v5  ;;  %v897_v40 = vsub.f32 1.0, %v896_v10 }
 0x37a   :  { %v888_v48 = vsel %vm885_vm7, %v887_v11, %v883_v30  ;;  %v912_v43 = vmul.f32 %v1625_v14, %v869_v26  ;;  %vm905_vm11 = vcmp.eq.f32.partialorder %v904_v51, 8.507059e+37 }
 0x37b   :  { %v911_v29 = vmul.f32 %v888_v48, %v2051_v23  ;;  %v898_v50 = vmul.f32 %v1623_v59, %v897_v40 }
 0x37d   :  { %v2087_v18 = vadd.f32 %v912_v43, %v911_v29  ;;  %v899_v35 = vadd.f32 %v1623_v59, %v898_v50 }
 0x37f   :  { %1626 = vtanh.f32 %v2087_v18  ;;  %v903_v47 = vsel %vm902_vm10, %v1623_v59, %v899_v35 }
 0x380   :  { %v908_v15 = vsel %vm905_vm11, %v907_v52, %v903_v47 }
 0x385   :  { %v1627_v22 = vpop.eup %1626 }
 0x386   :  { %v915_v49 = vmul.f32 %v1627_v22, %v908_v15 }
 0x388   :  { %v918_v55 = vpack.c.bf16 %v915_v49, %v915_v49 }
 0x38a   :  { %920 = vst [vmem:[#allocation9 + $0x10] sm:$0xf] %v918_v55  ;;  %940 = vmatmul.bf16.vlgmr.msrb.gmra.mxu0 %v918_v55  ;;  %953 = vmatmul.bf16.vlgmr.msrb.gmra.mxu1 %v918_v55 }
 0x38b   :  { %966 = vmatmul.bf16.vlgmr.msrb.gmra.mxu2 %v918_v55  ;;  %979 = vmatmul.bf16.vlgmr.msrb.gmra.mxu3 %v918_v55 }
 0x38c   :  { %1204 = vmatpush.bf16.msrb.mxu0 %v1783_v3  ;;  %1217 = vmatpush.bf16.msrb.mxu1 %v1785_v7  ;;  %v924_v3 = vld [vmem:[#allocation4 + $0x50] sm:$0xff] }
 0x38d   :  { %1230 = vmatpush.bf16.msrb.mxu2 %v1798_v21  ;;  %1243 = vmatpush.bf16.msrb.mxu3 %v1787_v8  ;;  %v926_v7 = vunpack.c.l.bf16 %v924_v3  ;;  %v927_v8 = vunpack.c.h.bf16 %v924_v3 }
 0x390   :  { %1205 = vmatpush.bf16.msrb.mxu0 %v1790_v12  ;;  %1218 = vmatpush.bf16.msrb.mxu1 %v1794_v16 }
 0x391   :  { %1231 = vmatpush.bf16.msrb.mxu2 %v1810_v34  ;;  %1244 = vmatpush.bf16.msrb.mxu3 %v1796_v17 }
 0x394   :  { %1206 = vmatpush.bf16.msrb.mxu0 %v1802_v28  ;;  %1219 = vmatpush.bf16.msrb.mxu1 %v1806_v32  ;;  %v925_v28 = vld [vmem:[#allocation4 + $0x58] sm:$0xff] }
 0x395   :  { %1232 = vmatpush.bf16.msrb.mxu2 %v1816_v42  ;;  %1245 = vmatpush.bf16.msrb.mxu3 %v1808_v33  ;;  %v929_v34 = vunpack.c.h.bf16 %v925_v28 }
 0x398   :  { %1207 = vmatpush.bf16.msrb.mxu0 %v1814_v41  ;;  %1220 = vmatpush.bf16.msrb.mxu1 %v1820_v45 }
 0x399   :  { %1233 = vmatpush.bf16.msrb.mxu2 %v1828_v54  ;;  %1246 = vmatpush.bf16.msrb.mxu3 %v1822_v46 }
 0x39c   :  { %1208 = vmatpush.bf16.msrb.mxu0 %v1826_v53  ;;  %1221 = vmatpush.bf16.msrb.mxu1 %v1832_v57 }
 0x39d   :  { %1234 = vmatpush.bf16.msrb.mxu2 %v1840_v2  ;;  %1247 = vmatpush.bf16.msrb.mxu3 %v1834_v58 }
 0x3a0   :  { %1209 = vmatpush.bf16.msrb.mxu0 %v1838_v1  ;;  %1222 = vmatpush.bf16.msrb.mxu1 %v1844_v6 }
 0x3a1   :  { %1235 = vmatpush.bf16.msrb.mxu2 %v1852_v20  ;;  %1248 = vmatpush.bf16.msrb.mxu3 %v1846_v9 }
 0x3a4   :  { %1210 = vmatpush.bf16.msrb.mxu0 %v1850_v19  ;;  %1223 = vmatpush.bf16.msrb.mxu1 %v1856_v24  ;;  %v928_v19 = vunpack.c.l.bf16 %v925_v28  ;;  %v1061_v28 = vld [vmem:[#allocation4 + $0x68] sm:$0xff] }
 0x3a5   :  { %1236 = vmatpush.bf16.msrb.mxu2 %v1864_v37  ;;  %1249 = vmatpush.bf16.msrb.mxu3 %v1858_v25 }
 0x3a8   :  { %1211 = vmatpush.bf16.msrb.mxu0 %v1862_v36  ;;  %1224 = vmatpush.bf16.msrb.mxu1 %v1868_v38 }
 0x3a9   :  { %1237 = vmatpush.bf16.msrb.mxu2 %v1876_v44  ;;  %1250 = vmatpush.bf16.msrb.mxu3 %v1870_v39 }
 0x407   :  { %v941_v12 = vpop.f32.mrf.mxu0  ;;  %v954_v16 = vpop.f32.mrf.mxu1 }
 0x408   :  { %v984_v17 = vadd.f32 %v941_v12, %v926_v7  ;;  %v985_v21 = vadd.f32 %v954_v16, %v927_v8 }
 0x40a   :  { %v1499_v32 = vmul.f32 -1.442695, %v984_v17  ;;  %v1500_v33 = vmul.f32 -1.442695, %v985_v21 }
 0x40c   :  { %1628 = vpow2.f32 %v1499_v32 }
 0x40d   :  { %1630 = vpow2.f32 %v1500_v33 }
 0x40e   :  { %v967_v41 = vpop.f32.mrf.mxu2  ;;  %v980_v42 = vpop.f32.mrf.mxu3 }
 0x40f   :  { %v987_v45 = vadd.f32 %v980_v42, %v929_v34  ;;  %v943_v46 = vpop.f32.mrf.mxu0  ;;  %v956_v53 = vpop.f32.mrf.mxu1  ;;  %v986_v36 = vadd.f32 %v967_v41, %v928_v19  ;;  %v1065_v34 = vunpack.c.h.bf16 %v1061_v28  ;;  %v1064_v19 = vunpack.c.l.bf16 %v1061_v28  ;;  %v1197_v28 = vld [vmem:[#allocation4 + $0x78] sm:$0xff] }
 0x411   :  { %v1501_v54 = vmul.f32 -1.442695, %v987_v45 }
 0x412   :  { %v1629_v57 = vpop.eup %1628 }
 0x413   :  { %v1631_v58 = vpop.eup %1630  ;;  %v991_v1 = vadd.f32 1.0, %v1629_v57  ;;  %1632 = vpow2.f32 %v1501_v54 }
 0x414   :  { %v1010_v2 = vadd.f32 1.0, %v1631_v58 }
 0x415   :  { %1634 = vrcp.f32 %v991_v1  ;;  %v1003_v31 = vand.u32 2147483648, %v991_v1  ;;  %v1001_v61 = vand.u32 2147483647, %v991_v1  ;;  %vm997_vm14 = vweird.f32 %v991_v1 }
 0x416   :  { %1636 = vrcp.f32 %v1010_v2  ;;  %v969_v6 = vpop.f32.mrf.mxu2  ;;  %v982_v9 = vpop.f32.mrf.mxu3  ;;  %v1022_v56 = vand.u32 2147483648, %v1010_v2  ;;  %v1020_v63 = vand.u32 2147483647, %v1010_v2  ;;  %vm1016_vm15 = vweird.f32 %v1010_v2 }
 0x417   :  { %v1004_v4 = vor.u32 1.1754944e-38, %v1003_v31  ;;  %vm1002_vm2 = vcmp.eq.f32.partialorder %v1001_v61, 8.507059e+37 }
 0x418   :  { %v1023_v11 = vor.u32 1.1754944e-38, %v1022_v56  ;;  %vm1021_vm3 = vcmp.eq.f32.partialorder %v1020_v63, 8.507059e+37 }
 0x419   :  { %v1633_v20 = vpop.eup %1632 }
 0x41a   :  { %v1030_v24 = vadd.f32 1.0, %v1633_v20 }
 0x41b   :  { %v1635_v25 = vpop.eup %1634 }
 0x41c   :  { %v1637_v37 = vpop.eup %1636  ;;  %v993_v38 = vmul.f32 %v1635_v25, %v991_v1  ;;  %1638 = vrcp.f32 %v1030_v24  ;;  %vm998_vm12 = vweird.f32 %v1635_v25  ;;  %v1042_v51 = vand.u32 2147483648, %v1030_v24 }
 0x41d   :  { %v1012_v39 = vmul.f32 %v1637_v37, %v1010_v2  ;;  %1640 = vtanh.f32 %v986_v36  ;;  %vm1017_vm13 = vweird.f32 %v1637_v37  ;;  %vm999_vm0 = vmor %vm997_vm14, %vm998_vm12  ;;  %vm1036_vm5 = vweird.f32 %v1030_v24 }
 0x41e   :  { %v994_v44 = vsub.f32 1.0, %v993_v38  ;;  %vm1018_vm1 = vmor %vm1016_vm15, %vm1017_vm13  ;;  %v1040_v47 = vand.u32 2147483647, %v1030_v24  ;;  %v1043_v22 = vor.u32 1.1754944e-38, %v1042_v51 }
 0x41f   :  { %v1013_v23 = vsub.f32 1.0, %v1012_v39 }
 0x420   :  { %v995_v60 = vmul.f32 %v1635_v25, %v994_v44  ;;  %vm1041_vm7 = vcmp.eq.f32.partialorder %v1040_v47, 8.507059e+37 }
 0x421   :  { %v1014_v62 = vmul.f32 %v1637_v37, %v1013_v23 }
 0x422   :  { %v1639_v59 = vpop.eup %1638  ;;  %v996_v0 = vadd.f32 %v1635_v25, %v995_v60 }
 0x423   :  { %v1015_v5 = vadd.f32 %v1637_v37, %v1014_v62  ;;  %v1032_v10 = vmul.f32 %v1639_v59, %v1030_v24  ;;  %v1641_v14 = vpop.eup %1640  ;;  %vm1037_vm4 = vweird.f32 %v1639_v59 }
 0x424   :  { %v1000_v13 = vsel %vm999_vm0, %v1635_v25, %v996_v0  ;;  %vm1038_vm6 = vmor %vm1036_vm5, %vm1037_vm4 }
 0x425   :  { %v1005_v26 = vsel %vm1002_vm2, %v1004_v4, %v1000_v13  ;;  %v1019_v30 = vsel %vm1018_vm1, %v1637_v37, %v1015_v5  ;;  %v1033_v40 = vsub.f32 1.0, %v1032_v10 }
 0x426   :  { %v1024_v48 = vsel %vm1021_vm3, %v1023_v11, %v1019_v30  ;;  %v1048_v43 = vmul.f32 %v1641_v14, %v1005_v26 }
 0x427   :  { %v1047_v29 = vmul.f32 %v1024_v48, %v2087_v18  ;;  %v1034_v50 = vmul.f32 %v1639_v59, %v1033_v40  ;;  %v1060_v18 = vld [vmem:[#allocation4 + $0x60] sm:$0xff] }
 0x428   :  { %v1062_v7 = vunpack.c.l.bf16 %v1060_v18  ;;  %v1063_v8 = vunpack.c.h.bf16 %v1060_v18 }
 0x429   :  { %v2123_v35 = vadd.f32 %v1048_v43, %v1047_v29  ;;  %v1035_v27 = vadd.f32 %v1639_v59, %v1034_v50 }
 0x42b   :  { %1642 = vtanh.f32 %v2123_v35  ;;  %v1039_v52 = vsel %vm1038_vm6, %v1639_v59, %v1035_v27 }
 0x42c   :  { %v1044_v49 = vsel %vm1041_vm7, %v1043_v22, %v1039_v52 }
 0x431   :  { %v1643_v15 = vpop.eup %1642 }
 0x432   :  { %v1051_v55 = vmul.f32 %v1643_v15, %v1044_v49 }
 0x434   :  { %v1054_v3 = vpack.c.bf16 %v1051_v55, %v1051_v55 }
 0x436   :  { %1056 = vst [vmem:[#allocation9 + $0x14] sm:$0xf] %v1054_v3  ;;  %1076 = vmatmul.bf16.vlgmr.msra.gmra.mxu0 %v1054_v3  ;;  %1089 = vmatmul.bf16.vlgmr.msra.gmra.mxu1 %v1054_v3 }
 0x437   :  { %1102 = vmatmul.bf16.vlgmr.msra.gmra.mxu2 %v1054_v3  ;;  %1115 = vmatmul.bf16.vlgmr.msra.gmra.mxu3 %v1054_v3 }
 0x4b3   :  { %v1077_v12 = vpop.f32.mrf.mxu0  ;;  %v1090_v16 = vpop.f32.mrf.mxu1 }
 0x4b4   :  { %v1120_v17 = vadd.f32 %v1077_v12, %v1062_v7  ;;  %v1121_v21 = vadd.f32 %v1090_v16, %v1063_v8 }
 0x4b6   :  { %v1502_v32 = vmul.f32 -1.442695, %v1120_v17  ;;  %v1503_v33 = vmul.f32 -1.442695, %v1121_v21 }
 0x4b8   :  { %1644 = vpow2.f32 %v1502_v32 }
 0x4b9   :  { %1646 = vpow2.f32 %v1503_v33 }
 0x4ba   :  { %v1103_v41 = vpop.f32.mrf.mxu2  ;;  %v1116_v42 = vpop.f32.mrf.mxu3 }
 0x4bb   :  { %v1123_v45 = vadd.f32 %v1116_v42, %v1065_v34  ;;  %v1079_v46 = vpop.f32.mrf.mxu0  ;;  %v1092_v53 = vpop.f32.mrf.mxu1  ;;  %v1122_v36 = vadd.f32 %v1103_v41, %v1064_v19  ;;  %v1201_v34 = vunpack.c.h.bf16 %v1197_v28  ;;  %v1200_v19 = vunpack.c.l.bf16 %v1197_v28 }
 0x4bd   :  { %v1504_v54 = vmul.f32 -1.442695, %v1123_v45 }
 0x4be   :  { %v1645_v57 = vpop.eup %1644 }
 0x4bf   :  { %v1647_v58 = vpop.eup %1646  ;;  %v1127_v1 = vadd.f32 1.0, %v1645_v57  ;;  %1648 = vpow2.f32 %v1504_v54 }
 0x4c0   :  { %v1146_v2 = vadd.f32 1.0, %v1647_v58 }
 0x4c1   :  { %1650 = vrcp.f32 %v1127_v1  ;;  %v1139_v31 = vand.u32 2147483648, %v1127_v1  ;;  %v1137_v61 = vand.u32 2147483647, %v1127_v1  ;;  %vm1133_vm10 = vweird.f32 %v1127_v1 }
 0x4c2   :  { %1652 = vrcp.f32 %v1146_v2  ;;  %v1105_v6 = vpop.f32.mrf.mxu2  ;;  %v1118_v9 = vpop.f32.mrf.mxu3  ;;  %v1158_v56 = vand.u32 2147483648, %v1146_v2  ;;  %v1156_v63 = vand.u32 2147483647, %v1146_v2  ;;  %vm1152_vm11 = vweird.f32 %v1146_v2 }
 0x4c3   :  { %v1140_v4 = vor.u32 1.1754944e-38, %v1139_v31  ;;  %vm1138_vm14 = vcmp.eq.f32.partialorder %v1137_v61, 8.507059e+37 }
 0x4c4   :  { %v1159_v11 = vor.u32 1.1754944e-38, %v1158_v56  ;;  %vm1157_vm15 = vcmp.eq.f32.partialorder %v1156_v63, 8.507059e+37 }
 0x4c5   :  { %v1649_v20 = vpop.eup %1648 }
 0x4c6   :  { %v1166_v24 = vadd.f32 1.0, %v1649_v20 }
 0x4c7   :  { %v1651_v25 = vpop.eup %1650 }
 0x4c8   :  { %v1653_v37 = vpop.eup %1652  ;;  %v1129_v38 = vmul.f32 %v1651_v25, %v1127_v1  ;;  %1654 = vrcp.f32 %v1166_v24  ;;  %vm1134_vm8 = vweird.f32 %v1651_v25  ;;  %v1178_v47 = vand.u32 2147483648, %v1166_v24 }
 0x4c9   :  { %v1148_v39 = vmul.f32 %v1653_v37, %v1146_v2  ;;  %1656 = vtanh.f32 %v1122_v36  ;;  %vm1153_vm9 = vweird.f32 %v1653_v37  ;;  %vm1135_vm12 = vmor %vm1133_vm10, %vm1134_vm8  ;;  %vm1172_vm1 = vweird.f32 %v1166_v24 }
 0x4ca   :  { %v1130_v44 = vsub.f32 1.0, %v1129_v38  ;;  %vm1154_vm13 = vmor %vm1152_vm11, %vm1153_vm9  ;;  %v1176_v52 = vand.u32 2147483647, %v1166_v24  ;;  %v1179_v15 = vor.u32 1.1754944e-38, %v1178_v47 }
 0x4cb   :  { %v1149_v23 = vsub.f32 1.0, %v1148_v39 }
 0x4cc   :  { %v1131_v60 = vmul.f32 %v1651_v25, %v1130_v44  ;;  %vm1177_vm3 = vcmp.eq.f32.partialorder %v1176_v52, 8.507059e+37 }
 0x4cd   :  { %v1150_v62 = vmul.f32 %v1653_v37, %v1149_v23 }
 0x4ce   :  { %v1655_v59 = vpop.eup %1654  ;;  %v1132_v0 = vadd.f32 %v1651_v25, %v1131_v60 }
 0x4cf   :  { %v1151_v5 = vadd.f32 %v1653_v37, %v1150_v62  ;;  %v1168_v10 = vmul.f32 %v1655_v59, %v1166_v24  ;;  %v1657_v14 = vpop.eup %1656  ;;  %vm1173_vm0 = vweird.f32 %v1655_v59 }
 0x4d0   :  { %v1136_v13 = vsel %vm1135_vm12, %v1651_v25, %v1132_v0  ;;  %vm1174_vm2 = vmor %vm1172_vm1, %vm1173_vm0 }
 0x4d1   :  { %v1141_v26 = vsel %vm1138_vm14, %v1140_v4, %v1136_v13  ;;  %v1155_v30 = vsel %vm1154_vm13, %v1653_v37, %v1151_v5  ;;  %v1169_v40 = vsub.f32 1.0, %v1168_v10 }
 0x4d2   :  { %v1160_v48 = vsel %vm1157_vm15, %v1159_v11, %v1155_v30  ;;  %v1184_v43 = vmul.f32 %v1657_v14, %v1141_v26 }
 0x4d3   :  { %v1183_v29 = vmul.f32 %v1160_v48, %v2123_v35  ;;  %v1170_v50 = vmul.f32 %v1655_v59, %v1169_v40  ;;  %v1196_v35 = vld [vmem:[#allocation4 + $0x70] sm:$0xff] }
 0x4d4   :  { %v1198_v7 = vunpack.c.l.bf16 %v1196_v35  ;;  %v1199_v8 = vunpack.c.h.bf16 %v1196_v35 }
 0x4d5   :  { %v2127_v27 = vadd.f32 %v1184_v43, %v1183_v29  ;;  %v1171_v51 = vadd.f32 %v1655_v59, %v1170_v50 }
 0x4d7   :  { %1658 = vtanh.f32 %v2127_v27  ;;  %v1175_v22 = vsel %vm1174_vm2, %v1655_v59, %v1171_v51 }
 0x4d8   :  { %v1180_v55 = vsel %vm1177_vm3, %v1179_v15, %v1175_v22 }
 0x4dd   :  { %v1659_v49 = vpop.eup %1658 }
 0x4de   :  { %v1187_v3 = vmul.f32 %v1659_v49, %v1180_v55 }
 0x4e0   :  { %v1190_v18 = vpack.c.bf16 %v1187_v3, %v1187_v3 }
 0x4e2   :  { %1192 = vst [vmem:[#allocation9 + $0x18] sm:$0xf] %v1190_v18  ;;  %1212 = vmatmul.bf16.vlgmr.msrb.gmra.mxu0 %v1190_v18  ;;  %1225 = vmatmul.bf16.vlgmr.msrb.gmra.mxu1 %v1190_v18 }
 0x4e3   :  { %1238 = vmatmul.bf16.vlgmr.msrb.gmra.mxu2 %v1190_v18  ;;  %1251 = vmatmul.bf16.vlgmr.msrb.gmra.mxu3 %v1190_v18 }
 0x55f   :  { %v1213_v12 = vpop.f32.mrf.mxu0  ;;  %v1226_v16 = vpop.f32.mrf.mxu1 }
 0x560   :  { %v1256_v17 = vadd.f32 %v1213_v12, %v1198_v7  ;;  %v1257_v21 = vadd.f32 %v1226_v16, %v1199_v8 }
 0x562   :  { %v1505_v32 = vmul.f32 -1.442695, %v1256_v17  ;;  %v1506_v33 = vmul.f32 -1.442695, %v1257_v21 }
 0x564   :  { %1660 = vpow2.f32 %v1505_v32 }
 0x565   :  { %1662 = vpow2.f32 %v1506_v33 }
 0x566   :  { %v1239_v41 = vpop.f32.mrf.mxu2  ;;  %v1252_v42 = vpop.f32.mrf.mxu3 }
 0x567   :  { %v1259_v45 = vadd.f32 %v1252_v42, %v1201_v34  ;;  %v1215_v46 = vpop.f32.mrf.mxu0  ;;  %v1228_v53 = vpop.f32.mrf.mxu1  ;;  %v1258_v36 = vadd.f32 %v1239_v41, %v1200_v19 }
 0x569   :  { %v1507_v54 = vmul.f32 -1.442695, %v1259_v45 }
 0x56a   :  { %v1661_v57 = vpop.eup %1660 }
 0x56b   :  { %v1663_v58 = vpop.eup %1662  ;;  %v1263_v1 = vadd.f32 1.0, %v1661_v57  ;;  %1664 = vpow2.f32 %v1507_v54 }
 0x56c   :  { %v1282_v2 = vadd.f32 1.0, %v1663_v58 }
 0x56d   :  { %1666 = vrcp.f32 %v1263_v1  ;;  %v1275_v31 = vand.u32 2147483648, %v1263_v1  ;;  %v1273_v61 = vand.u32 2147483647, %v1263_v1  ;;  %vm1269_vm6 = vweird.f32 %v1263_v1 }
 0x56e   :  { %1668 = vrcp.f32 %v1282_v2  ;;  %v1241_v6 = vpop.f32.mrf.mxu2  ;;  %v1254_v9 = vpop.f32.mrf.mxu3  ;;  %v1294_v56 = vand.u32 2147483648, %v1282_v2  ;;  %v1292_v63 = vand.u32 2147483647, %v1282_v2  ;;  %vm1288_vm7 = vweird.f32 %v1282_v2 }
 0x56f   :  { %v1276_v4 = vor.u32 1.1754944e-38, %v1275_v31  ;;  %vm1274_vm10 = vcmp.eq.f32.partialorder %v1273_v61, 8.507059e+37 }
 0x570   :  { %v1295_v11 = vor.u32 1.1754944e-38, %v1294_v56  ;;  %vm1293_vm11 = vcmp.eq.f32.partialorder %v1292_v63, 8.507059e+37 }
 0x571   :  { %v1665_v20 = vpop.eup %1664 }
 0x572   :  { %v1302_v24 = vadd.f32 1.0, %v1665_v20 }
 0x573   :  { %v1667_v25 = vpop.eup %1666 }
 0x574   :  { %v1669_v37 = vpop.eup %1668  ;;  %v1265_v38 = vmul.f32 %v1667_v25, %v1263_v1  ;;  %1670 = vrcp.f32 %v1302_v24  ;;  %vm1270_vm4 = vweird.f32 %v1667_v25  ;;  %v1314_v52 = vand.u32 2147483648, %v1302_v24 }
 0x575   :  { %v1284_v39 = vmul.f32 %v1669_v37, %v1282_v2  ;;  %1672 = vtanh.f32 %v1258_v36  ;;  %vm1289_vm5 = vweird.f32 %v1669_v37  ;;  %vm1271_vm8 = vmor %vm1269_vm6, %vm1270_vm4  ;;  %vm1308_vm13 = vweird.f32 %v1302_v24 }
 0x576   :  { %v1266_v44 = vsub.f32 1.0, %v1265_v38  ;;  %vm1290_vm9 = vmor %vm1288_vm7, %vm1289_vm5  ;;  %v1312_v22 = vand.u32 2147483647, %v1302_v24  ;;  %v1315_v49 = vor.u32 1.1754944e-38, %v1314_v52 }
 0x577   :  { %v1285_v23 = vsub.f32 1.0, %v1284_v39 }
 0x578   :  { %v1267_v60 = vmul.f32 %v1667_v25, %v1266_v44  ;;  %vm1313_vm15 = vcmp.eq.f32.partialorder %v1312_v22, 8.507059e+37 }
 0x579   :  { %v1286_v62 = vmul.f32 %v1669_v37, %v1285_v23 }
 0x57a   :  { %v1671_v59 = vpop.eup %1670  ;;  %v1268_v0 = vadd.f32 %v1667_v25, %v1267_v60 }
 0x57b   :  { %v1287_v5 = vadd.f32 %v1669_v37, %v1286_v62  ;;  %v1304_v10 = vmul.f32 %v1671_v59, %v1302_v24  ;;  %v1673_v14 = vpop.eup %1672  ;;  %vm1309_vm12 = vweird.f32 %v1671_v59 }
 0x57c   :  { %v1272_v13 = vsel %vm1271_vm8, %v1667_v25, %v1268_v0  ;;  %vm1310_vm14 = vmor %vm1308_vm13, %vm1309_vm12 }
 0x57d   :  { %v1277_v26 = vsel %vm1274_vm10, %v1276_v4, %v1272_v13  ;;  %v1291_v30 = vsel %vm1290_vm9, %v1669_v37, %v1287_v5  ;;  %v1305_v40 = vsub.f32 1.0, %v1304_v10 }
 0x57e   :  { %v1296_v48 = vsel %vm1293_vm11, %v1295_v11, %v1291_v30  ;;  %v1320_v43 = vmul.f32 %v1673_v14, %v1277_v26 }
 0x57f   :  { %v1319_v29 = vmul.f32 %v1296_v48, %v2127_v27  ;;  %v1306_v50 = vmul.f32 %v1671_v59, %v1305_v40 }
 0x581   :  { %v1321_v51 = vadd.f32 %v1320_v43, %v1319_v29  ;;  %v1307_v47 = vadd.f32 %v1671_v59, %v1306_v50 }
 0x583   :  { %1674 = vtanh.f32 %v1321_v51  ;;  %v1311_v15 = vsel %vm1310_vm14, %v1671_v59, %v1307_v47 }
 0x584   :  { %v1316_v27 = vsel %vm1313_vm15, %v1315_v49, %v1311_v15 }
 0x589   :  { %v1675_v55 = vpop.eup %1674 }
 0x58a   :  { %v1323_v3 = vmul.f32 %v1675_v55, %v1316_v27 }
 0x58c   :  { %v1326_v18 = vpack.c.bf16 %v1323_v3, %v1323_v3 }
 0x58e   :  { %1328 = vst [vmem:[#allocation9 + $0x1c] sm:$0xf] %v1326_v18 }
 0x58f   :  { %1341 = dma.vmem_to_hbm [thread:$0]  %s1334_s1, 512, %s1336_s23, [#allocation6], %s1760_s24, %s1760_s24, %s1761_s25  }
 0x590   :  { %1752 = dma.done.wait [#allocation6], 512  }
 0x591   :  { %1753 = vsyncadd [#allocation6], 4294966784 }
 0x592   :  { %1346 = vsyncpa [#allocation5], 1 }
 0x593   :  { %1347 = vsyncpa [#allocation8], 1 }
 0x594   :  { %1348 = vsyncpa [#allocation6], 1 }

</bundles_post_ra>
